<compile_context>
chip_gen: v7x
topology: tpu7x:2x2x1
jax: 0.10.0
libtpu: 0.0.40
codegen_flags: <defaults>
</compile_context>

<pallas_src>
import functools

import jax
import jax.numpy as jnp
from jax.experimental import pallas as pl
from jax.experimental.pallas import tpu as pltpu


# ---------------------------------------------------------------------------
# In-kernel helpers (operate on jnp values loaded from VMEM refs)
# ---------------------------------------------------------------------------
def _layernorm(x, g, b, eps=1e-5):
    # PyTorch nn.LayerNorm: biased variance over last dim, eps inside sqrt.
    mu = jnp.mean(x, axis=-1, keepdims=True)
    xc = x - mu
    var = jnp.mean(xc * xc, axis=-1, keepdims=True)
    return xc * jax.lax.rsqrt(var + eps) * g + b


def _erf_approx(x):
    # Abramowitz & Stegun 7.1.26 (|abs err| <= 1.5e-7): keeps nn.GELU()'s
    # exact-erf semantics using only exp/mul/add/where (robust Mosaic lowering).
    a1, a2, a3, a4, a5 = 0.254829592, -0.284496736, 1.421413741, -1.453152027, 1.061405429
    p = 0.3275911
    ax = jnp.abs(x)
    t = 1.0 / (1.0 + p * ax)
    poly = ((((a5 * t + a4) * t + a3) * t + a2) * t + a1) * t
    y = 1.0 - poly * jnp.exp(-ax * ax)
    return jnp.where(x >= 0.0, y, -y)


def _gelu_exact(x):
    return 0.5 * x * (1.0 + _erf_approx(x * 0.7071067811865476))


def _softmax_last(x):
    m = jnp.max(x, axis=-1, keepdims=True)
    e = jnp.exp(x - m)
    s = jnp.sum(e, axis=-1, keepdims=True)
    # EUP reciprocal + VPU multiply keeps the VALU slots free.
    return e * pl.reciprocal(s, approx=True)


def _vmem_limit_bytes(headroom=16 * 1024 * 1024):
    """Scoped-VMEM limit derived per chip generation (capacity - headroom)."""
    try:
        cap = int(pltpu.get_tpu_info().vmem_capacity_bytes)
    except Exception:
        cap = 64 * 1024 * 1024  # conservative fallback (v7x physical size)
    return max(cap - headroom, cap // 2)


# ---------------------------------------------------------------------------
# Fused transformer kernel: grid = (batch_blocks, depth)
# ---------------------------------------------------------------------------
def fused_transformer_kernel(
    x_ref,       # (1, n_tok, dim)            f32  -- block b (same across layers)
    vec_ref,     # (1, 8, max(dim, mlp))      f32  -- packed per-layer vectors
    wqkv_ref,    # (1, 3*heads, dim, dh)      bf16 -- per-layer, Wq pre-scaled
    wout_ref,    # (1, heads, dh, dim)        bf16 -- per-layer
    w1_ref,      # (1, dim, mlp)              bf16 -- per-layer
    w2_ref,      # (1, mlp, dim)              bf16 -- per-layer
    norm_ref,    # (2, dim)                   f32  -- final LayerNorm gamma/beta
    o_ref,       # (1, n_tok, dim)            f32
    x_acc,       # VMEM scratch (n_tok, dim)  f32  -- carried across layers
    *, heads, batch_block, seq_len, dim, mlp_dim,
):
    layer = pl.program_id(1)
    last = pl.num_programs(1) - 1
    n_tok = batch_block * seq_len
    bf16 = jnp.bfloat16
    f32 = jnp.float32

    # Load the residual stream into the VMEM carry once per batch block.
    @pl.when(layer == 0)
    def _():
        x_acc[...] = x_ref[0]

    # Packed per-layer vectors (one DMA): rows = ln1_g, ln1_b, b_out, ln2_g,
    # ln2_b, b2, b1, pad.
    vecs = vec_ref[0]                                   # (8, W) f32
    ln1_g, ln1_b = vecs[0:1, :dim], vecs[1:2, :dim]
    b_out = vecs[2:3, :dim]
    ln2_g, ln2_b = vecs[3:4, :dim], vecs[4:5, :dim]
    b2 = vecs[5:6, :dim]
    b1 = vecs[6:7, :mlp_dim]

    x = x_acc[...]                                      # (n_tok, dim) f32

    # ------------------- Attention block: x = attn(LN(x)) + x ---------------
    xn = _layernorm(x, ln1_g, ln1_b).astype(bf16)       # cast once for all heads
    proj = jnp.zeros((n_tok, dim), f32)                 # head-summed projection
    for h in range(heads):
        # Per-head projections: weights are already head-split in VMEM, so
        # these are leading-index loads + 2-D MXU matmuls (no lane slicing of
        # activations).  The softmax scale is folded into Wq in the wrapper.
        qh = jnp.dot(xn, wqkv_ref[0, h], preferred_element_type=f32).astype(bf16)
        kh = jnp.dot(xn, wqkv_ref[0, heads + h], preferred_element_type=f32).astype(bf16)
        vh = jnp.dot(xn, wqkv_ref[0, 2 * heads + h], preferred_element_type=f32).astype(bf16)

        outs = []
        for b in range(batch_block):                    # sublane-aligned row blocks
            lo, hi = b * seq_len, (b + 1) * seq_len
            s = jax.lax.dot_general(                    # (N, N) scores, NT matmul
                qh[lo:hi], kh[lo:hi], (((1,), (1,)), ((), ())),
                preferred_element_type=f32)
            a = _softmax_last(s).astype(bf16)
            outs.append(jnp.dot(a, vh[lo:hi], preferred_element_type=f32))  # (N, dh)
        oh = outs[0] if batch_block == 1 else jnp.concatenate(outs, axis=0)  # (n_tok, dh)

        # Output projection accumulated head-by-head into ONE (n_tok, dim) f32
        # buffer -- no (heads, n_tok, dim) intermediate, no extra head-sum.
        proj = proj + jnp.dot(oh.astype(bf16), wout_ref[0, h],
                              preferred_element_type=f32)
    x = x + proj + b_out

    # ------------------- FeedForward block: x = ff(LN(x)) + x ---------------
    xn2 = _layernorm(x, ln2_g, ln2_b).astype(bf16)
    h1 = jnp.dot(xn2, w1_ref[0], preferred_element_type=f32) + b1
    h1 = _gelu_exact(h1)
    h2 = jnp.dot(h1.astype(bf16), w2_ref[0], preferred_element_type=f32) + b2
    x = x + h2

    x_acc[...] = x                                      # carry to next layer

    # Final LayerNorm + writeback only on the last layer (output block index is
    # layer-independent, so the VMEM output buffer is written back to HBM only
    # after the last layer of this batch block).
    @pl.when(layer == last)
    def _():
        o_ref[0] = _layernorm(x, norm_ref[0:1, :], norm_ref[1:2, :])


# ---------------------------------------------------------------------------
# Wrapper: head-split + pre-scaled weights, packed vectors, one pallas_call
# ---------------------------------------------------------------------------
def transformer_forward(x, params, *, heads, dim_head, batch_block=None):
    B, N, dim = x.shape
    layers = params["layers"]
    depth = len(layers)
    inner = heads * dim_head
    mlp_dim = layers[0]["w1"].shape[-1]
    bf16 = jnp.bfloat16
    scale = dim_head ** (-0.5)

    if batch_block is None:
        # Amortize per-layer weight DMA over several sequences per grid step
        # while keeping >=2 blocks on the parallel axis (v7x has 2 TensorCores).
        batch_block = B // 2 if (B % 2 == 0 and B >= 4) else 1
    assert B % batch_block == 0, "batch must divide evenly into batch blocks"
    n_blocks = B // batch_block
    n_tok = batch_block * N

    # ---- per-layer weights: stacked along depth, head-split, bf16 for MXU ----
    def per_head_in(w):  # (dim, inner) -> (heads, dim, dh)
        return w.reshape(dim, heads, dim_head).transpose(1, 0, 2)

    vw = max(dim, mlp_dim)
    wqkv_l, wout_l, w1_l, w2_l, vec_l = [], [], [], [], []
    for lp in layers:
        wq = per_head_in(lp["w_qkv"][:, :inner] * scale)       # scale folded into Wq
        wk = per_head_in(lp["w_qkv"][:, inner:2 * inner])
        wv = per_head_in(lp["w_qkv"][:, 2 * inner:])
        wqkv_l.append(jnp.concatenate([wq, wk, wv], axis=0))   # (3*heads, dim, dh)
        wout_l.append(lp["w_out"].reshape(heads, dim_head, dim))  # (heads, dh, dim)
        w1_l.append(lp["w1"])
        w2_l.append(lp["w2"])
        rows = [lp["ln1_g"], lp["ln1_b"], lp["b_out"], lp["ln2_g"],
                lp["ln2_b"], lp["b2"], lp["b1"],
                jnp.zeros((1, vw), jnp.float32)]
        vec_l.append(jnp.concatenate(
            [jnp.pad(r, ((0, 0), (0, vw - r.shape[-1]))) for r in rows], axis=0))

    w_qkv = jnp.stack(wqkv_l).astype(bf16)                     # (depth, 3*heads, dim, dh)
    w_out = jnp.stack(wout_l).astype(bf16)                     # (depth, heads, dh, dim)
    w1 = jnp.stack(w1_l).astype(bf16)                          # (depth, dim, mlp)
    w2 = jnp.stack(w2_l).astype(bf16)                          # (depth, mlp, dim)
    vecs = jnp.stack(vec_l)                                    # (depth, 8, vw) f32
    norm_gb = jnp.concatenate([params["norm_g"], params["norm_b"]], axis=0)  # (2, dim)

    # Fold batch_block sequences into the matmul M dimension (free XLA reshape).
    xr = x.reshape(n_blocks, n_tok, dim)

    kernel = functools.partial(
        fused_transformer_kernel, heads=heads, batch_block=batch_block,
        seq_len=N, dim=dim, mlp_dim=mlp_dim)

    def layer_spec(arr):
        blk = (1,) + arr.shape[1:]
        nd = len(blk)
        return pl.BlockSpec(blk, lambda b, l, _nd=nd: (l,) + (0,) * (_nd - 1))

    out = pl.pallas_call(
        kernel,
        out_shape=jax.ShapeDtypeStruct((n_blocks, n_tok, dim), x.dtype),
        grid=(n_blocks, depth),
        in_specs=[
            pl.BlockSpec((1, n_tok, dim), lambda b, l: (b, 0, 0)),
            layer_spec(vecs),
            layer_spec(w_qkv),
            layer_spec(w_out),
            layer_spec(w1),
            layer_spec(w2),
            pl.BlockSpec(norm_gb.shape, lambda b, l: (0, 0)),
        ],
        out_specs=pl.BlockSpec((1, n_tok, dim), lambda b, l: (b, 0, 0)),
        scratch_shapes=[pltpu.VMEM((n_tok, dim), jnp.float32)],
        compiler_params=pltpu.CompilerParams(
            dimension_semantics=("parallel", "arbitrary"),
            vmem_limit_bytes=_vmem_limit_bytes()),
    )(xr, vecs, w_qkv, w_out, w1, w2, norm_gb)
    return out.reshape(B, N, dim)


# ---------------------------------------------------------------------------
# Pure-JAX reference (mirrors the PyTorch forward, f32 end-to-end)
# ---------------------------------------------------------------------------
def reference_forward(x, params, *, heads, dim_head):
    inner = heads * dim_head

    def ln(v, g, b):
        mu = jnp.mean(v, axis=-1, keepdims=True)
        var = jnp.mean((v - mu) ** 2, axis=-1, keepdims=True)
        return (v - mu) / jnp.sqrt(var + 1e-5) * g + b

    scale = dim_head ** (-0.5)
    for lp in params["layers"]:
        xn = ln(x, lp["ln1_g"], lp["ln1_b"])
        qkv = xn @ lp["w_qkv"]
        q, k, v = jnp.split(qkv, 3, axis=-1)
        B, N, _ = x.shape
        resh = lambda t: t.reshape(B, N, heads, dim_head).transpose(0, 2, 1, 3)
        q, k, v = resh(q), resh(k), resh(v)
        dots = jnp.einsum("bhnd,bhmd->bhnm", q, k) * scale
        attn = jax.nn.softmax(dots, axis=-1)
        out = jnp.einsum("bhnm,bhmd->bhnd", attn, v)
        out = out.transpose(0, 2, 1, 3).reshape(B, N, inner)
        x = x + out @ lp["w_out"] + lp["b_out"]

        xn2 = ln(x, lp["ln2_g"], lp["ln2_b"])
        h1 = jax.nn.gelu(xn2 @ lp["w1"] + lp["b1"], approximate=False)
        x = x + h1 @ lp["w2"] + lp["b2"]

    return ln(x, params["norm_g"], params["norm_b"])


# ---------------------------------------------------------------------------
# Deterministic parameter construction
# ---------------------------------------------------------------------------
def make_params(key, *, dim, depth, heads, dim_head, mlp_dim):
    inner = heads * dim_head
    layers = []
    for _ in range(depth):
        key, *ks = jax.random.split(key, 8)
        layers.append({
            "ln1_g": jnp.ones((1, dim), jnp.float32),
            "ln1_b": jnp.zeros((1, dim), jnp.float32),
            "w_qkv": 0.02 * jax.random.normal(ks[0], (dim, 3 * inner), jnp.float32),
            "w_out": 0.02 * jax.random.normal(ks[1], (inner, dim), jnp.float32),
            "b_out": 0.01 * jax.random.normal(ks[2], (1, dim), jnp.float32),
            "ln2_g": jnp.ones((1, dim), jnp.float32),
            "ln2_b": jnp.zeros((1, dim), jnp.float32),
            "w1": 0.02 * jax.random.normal(ks[3], (dim, mlp_dim), jnp.float32),
            "b1": 0.01 * jax.random.normal(ks[4], (1, mlp_dim), jnp.float32),
            "w2": 0.02 * jax.random.normal(ks[5], (mlp_dim, dim), jnp.float32),
            "b2": 0.01 * jax.random.normal(ks[6], (1, dim), jnp.float32),
        })
    return {
        "layers": layers,
        "norm_g": jnp.ones((1, dim), jnp.float32),
        "norm_b": jnp.zeros((1, dim), jnp.float32),
    }, key


if __name__ == "__main__":
    # Small ViT-style transformer config (dropout == 0 -> identity).
    B, N = 4, 8
    dim, depth, heads, dim_head, mlp_dim = 32, 2, 4, 16, 64

    key = jax.random.PRNGKey(0)
    key, xk = jax.random.split(key)
    x = jax.random.normal(xk, (B, N, dim), jnp.float32)

    params, key = make_params(key, dim=dim, depth=depth, heads=heads,
                              dim_head=dim_head, mlp_dim=mlp_dim)

    out = transformer_forward(x, params, heads=heads, dim_head=dim_head)
    out = jax.block_until_ready(out)

    ref = reference_forward(x, params, heads=heads, dim_head=dim_head)
    assert out.shape == (B, N, dim)
    # bf16 MXU operands (f32 accumulation) + approx softmax reciprocal + erf
    # polynomial vs a pure-f32 reference.
    assert jnp.allclose(out, ref, atol=2e-2, rtol=2e-2), "mismatch vs reference"

    print("KERNEL_OK")
</pallas_src>

<mosaic_0001>
module attributes {stable_mosaic.version = 11 : i64} {
  func.func @fused_transformer_kernel(%arg0: i32, %arg1: i32, %arg2: memref<1x16x32xf32, #tpu.memory_space<vmem>>, %arg3: memref<1x8x64xf32, #tpu.memory_space<vmem>>, %arg4: memref<1x12x32x16xbf16, #tpu.memory_space<vmem>>, %arg5: memref<1x4x16x32xbf16, #tpu.memory_space<vmem>>, %arg6: memref<1x32x64xbf16, #tpu.memory_space<vmem>>, %arg7: memref<1x64x32xbf16, #tpu.memory_space<vmem>>, %arg8: memref<2x32xf32, #tpu.memory_space<vmem>>, %arg9: memref<1x16x32xf32, #tpu.memory_space<vmem>>, %arg10: memref<16x32xf32, #tpu.memory_space<vmem>>) attributes {dimension_semantics = [#tpu.dimension_semantics<parallel>, #tpu.dimension_semantics<arbitrary>], iteration_bounds = array<i64: 2, 2>, scalar_prefetch = 0 : i64, scratch_operands = 1 : i64, tpu.core_type = #tpu.core_type<tc>, window_params = [{transform_indices = @transform_0, window_bounds = array<i64: 1, 16, 32>}, {transform_indices = @transform_1, window_bounds = array<i64: 1, 8, 64>}, {transform_indices = @transform_2, window_bounds = array<i64: 1, 12, 32, 16>}, {transform_indices = @transform_3, window_bounds = array<i64: 1, 4, 16, 32>}, {transform_indices = @transform_4, window_bounds = array<i64: 1, 32, 64>}, {transform_indices = @transform_5, window_bounds = array<i64: 1, 64, 32>}, {pipeline_mode = #tpu.pipeline_mode<synchronous>, transform_indices = @transform_6, window_bounds = array<i64: 2, 32>}, {transform_indices = @transform_7, window_bounds = array<i64: 1, 16, 32>}]} {
    %c0_i32 = arith.constant 0 : i32
    %0 = arith.cmpi eq, %arg1, %c0_i32 : i32
    %1 = arith.extui %0 : i1 to i32
    %c0_i32_0 = arith.constant 0 : i32
    %2 = arith.cmpi ne, %1, %c0_i32_0 : i32
    scf.if %2 {
      %c0_142 = arith.constant 0 : index
      %c0_143 = arith.constant 0 : index
      %c0_144 = arith.constant 0 : index
      %315 = vector.load %arg2[%c0_142, %c0_143, %c0_144] : memref<1x16x32xf32, #tpu.memory_space<vmem>>, vector<1x16x32xf32>
      %316 = vector.shape_cast %315 : vector<1x16x32xf32> to vector<16x32xf32>
      %c0_145 = arith.constant 0 : index
      %c0_146 = arith.constant 0 : index
      %317 = vector.load %arg10[%c0_145, %c0_146] : memref<16x32xf32, #tpu.memory_space<vmem>>, vector<16x32xf32>
      tpu.vector_store %arg10[%c0_145, %c0_146], %316 {strides = array<i32>} : memref<16x32xf32, #tpu.memory_space<vmem>>, vector<16x32xf32>,
    } else {
    }
    %c0 = arith.constant 0 : index
    %c0_1 = arith.constant 0 : index
    %c0_2 = arith.constant 0 : index
    %3 = vector.load %arg3[%c0, %c0_1, %c0_2] : memref<1x8x64xf32, #tpu.memory_space<vmem>>, vector<1x8x64xf32>
    %4 = vector.shape_cast %3 : vector<1x8x64xf32> to vector<8x64xf32>
    %5 = vector.extract_strided_slice %4 {offsets = [0, 0], sizes = [1, 32], strides = [1, 1]} : vector<8x64xf32> to vector<1x32xf32>
    %6 = vector.extract_strided_slice %4 {offsets = [1, 0], sizes = [1, 32], strides = [1, 1]} : vector<8x64xf32> to vector<1x32xf32>
    %7 = vector.extract_strided_slice %4 {offsets = [2, 0], sizes = [1, 32], strides = [1, 1]} : vector<8x64xf32> to vector<1x32xf32>
    %8 = vector.extract_strided_slice %4 {offsets = [3, 0], sizes = [1, 32], strides = [1, 1]} : vector<8x64xf32> to vector<1x32xf32>
    %9 = vector.extract_strided_slice %4 {offsets = [4, 0], sizes = [1, 32], strides = [1, 1]} : vector<8x64xf32> to vector<1x32xf32>
    %10 = vector.extract_strided_slice %4 {offsets = [5, 0], sizes = [1, 32], strides = [1, 1]} : vector<8x64xf32> to vector<1x32xf32>
    %11 = vector.extract_strided_slice %4 {offsets = [6, 0], sizes = [1, 64], strides = [1, 1]} : vector<8x64xf32> to vector<1x64xf32>
    %c0_3 = arith.constant 0 : index
    %c0_4 = arith.constant 0 : index
    %12 = vector.load %arg10[%c0_3, %c0_4] : memref<16x32xf32, #tpu.memory_space<vmem>>, vector<16x32xf32>
    %cst = arith.constant dense<0.000000e+00> : vector<16xf32>
    %13 = vector.multi_reduction <add>, %12, %cst [1] : vector<16x32xf32> to vector<16xf32>
    %14 = vector.shape_cast %13 : vector<16xf32> to vector<16x1xf32>
    %cst_5 = arith.constant 3.200000e+01 : f32
    %15 = vector.broadcast %cst_5 : f32 to vector<16x1xf32>
    %16 = arith.divf %14, %15 : vector<16x1xf32>
    %17 = vector.broadcast %16 : vector<16x1xf32> to vector<16x32xf32>
    %18 = arith.subf %12, %17 : vector<16x32xf32>
    %19 = arith.mulf %18, %18 : vector<16x32xf32>
    %cst_6 = arith.constant dense<0.000000e+00> : vector<16xf32>
    %20 = vector.multi_reduction <add>, %19, %cst_6 [1] : vector<16x32xf32> to vector<16xf32>
    %21 = vector.shape_cast %20 : vector<16xf32> to vector<16x1xf32>
    %cst_7 = arith.constant 3.200000e+01 : f32
    %22 = vector.broadcast %cst_7 : f32 to vector<16x1xf32>
    %23 = arith.divf %21, %22 : vector<16x1xf32>
    %cst_8 = arith.constant 9.99999974E-6 : f32
    %24 = vector.broadcast %cst_8 : f32 to vector<16x1xf32>
    %25 = arith.addf %23, %24 : vector<16x1xf32>
    %26 = math.rsqrt %25 : vector<16x1xf32>
    %27 = vector.broadcast %26 : vector<16x1xf32> to vector<16x32xf32>
    %28 = arith.mulf %18, %27 : vector<16x32xf32>
    %29 = vector.broadcast %5 : vector<1x32xf32> to vector<16x32xf32>
    %30 = arith.mulf %28, %29 : vector<16x32xf32>
    %31 = vector.broadcast %6 : vector<1x32xf32> to vector<16x32xf32>
    %32 = arith.addf %30, %31 : vector<16x32xf32>
    %33 = arith.truncf %32 : vector<16x32xf32> to vector<16x32xbf16>
    %cst_9 = arith.constant 0.000000e+00 : f32
    %34 = vector.broadcast %cst_9 : f32 to vector<16x32xf32>
    %c0_10 = arith.constant 0 : index
    %c0_11 = arith.constant 0 : index
    %c0_12 = arith.constant 0 : index
    %c0_13 = arith.constant 0 : index
    %35 = vector.load %arg4[%c0_10, %c0_11, %c0_12, %c0_13] : memref<1x12x32x16xbf16, #tpu.memory_space<vmem>>, vector<1x1x32x16xbf16>
    %36 = vector.shape_cast %35 : vector<1x1x32x16xbf16> to vector<32x16xbf16>
    %cst_14 = arith.constant dense<0.000000e+00> : vector<16x16xf32>
    %37 = tpu.matmul %33, %36, %cst_14 {dimension_numbers = #tpu.dot_dimension_numbers<[1], [0], [0], [1], [0, 0, 1, 1], [], []>} : vector<16x32xbf16>, vector<32x16xbf16>, vector<16x16xf32> -> vector<16x16xf32>
    %38 = arith.truncf %37 : vector<16x16xf32> to vector<16x16xbf16>
    %c0_15 = arith.constant 0 : index
    %c4 = arith.constant 4 : index
    %c0_16 = arith.constant 0 : index
    %c0_17 = arith.constant 0 : index
    %39 = vector.load %arg4[%c0_15, %c4, %c0_16, %c0_17] : memref<1x12x32x16xbf16, #tpu.memory_space<vmem>>, vector<1x1x32x16xbf16>
    %40 = vector.shape_cast %39 : vector<1x1x32x16xbf16> to vector<32x16xbf16>
    %cst_18 = arith.constant dense<0.000000e+00> : vector<16x16xf32>
    %41 = tpu.matmul %33, %40, %cst_18 {dimension_numbers = #tpu.dot_dimension_numbers<[1], [0], [0], [1], [0, 0, 1, 1], [], []>} : vector<16x32xbf16>, vector<32x16xbf16>, vector<16x16xf32> -> vector<16x16xf32>
    %42 = arith.truncf %41 : vector<16x16xf32> to vector<16x16xbf16>
    %c0_19 = arith.constant 0 : index
    %c8 = arith.constant 8 : index
    %c0_20 = arith.constant 0 : index
    %c0_21 = arith.constant 0 : index
    %43 = vector.load %arg4[%c0_19, %c8, %c0_20, %c0_21] : memref<1x12x32x16xbf16, #tpu.memory_space<vmem>>, vector<1x1x32x16xbf16>
    %44 = vector.shape_cast %43 : vector<1x1x32x16xbf16> to vector<32x16xbf16>
    %cst_22 = arith.constant dense<0.000000e+00> : vector<16x16xf32>
    %45 = tpu.matmul %33, %44, %cst_22 {dimension_numbers = #tpu.dot_dimension_numbers<[1], [0], [0], [1], [0, 0, 1, 1], [], []>} : vector<16x32xbf16>, vector<32x16xbf16>, vector<16x16xf32> -> vector<16x16xf32>
    %46 = arith.truncf %45 : vector<16x16xf32> to vector<16x16xbf16>
    %47 = vector.extract_strided_slice %38 {offsets = [0, 0], sizes = [8, 16], strides = [1, 1]} : vector<16x16xbf16> to vector<8x16xbf16>
    %48 = vector.extract_strided_slice %42 {offsets = [0, 0], sizes = [8, 16], strides = [1, 1]} : vector<16x16xbf16> to vector<8x16xbf16>
    %cst_23 = arith.constant dense<0.000000e+00> : vector<8x8xf32>
    %49 = tpu.matmul %47, %48, %cst_23 {dimension_numbers = #tpu.dot_dimension_numbers<[1], [1], [0], [0], [0, 0, 1, 0], [], []>} : vector<8x16xbf16>, vector<8x16xbf16>, vector<8x8xf32> -> vector<8x8xf32>
    %cst_24 = arith.constant dense<0xFF800000> : vector<8xf32>
    %50 = vector.multi_reduction <maximumf>, %49, %cst_24 [1] : vector<8x8xf32> to vector<8xf32>
    %51 = vector.shape_cast %50 : vector<8xf32> to vector<8x1xf32>
    %52 = vector.broadcast %51 : vector<8x1xf32> to vector<8x8xf32>
    %53 = arith.subf %49, %52 : vector<8x8xf32>
    %54 = math.exp %53 : vector<8x8xf32>
    %cst_25 = arith.constant dense<0.000000e+00> : vector<8xf32>
    %55 = vector.multi_reduction <add>, %54, %cst_25 [1] : vector<8x8xf32> to vector<8xf32>
    %56 = vector.shape_cast %55 : vector<8xf32> to vector<8x1xf32>
    %57 = tpu.reciprocal %56 {approx = true} : vector<8x1xf32> -> vector<8x1xf32>
    %58 = vector.broadcast %57 : vector<8x1xf32> to vector<8x8xf32>
    %59 = arith.mulf %54, %58 : vector<8x8xf32>
    %60 = arith.truncf %59 : vector<8x8xf32> to vector<8x8xbf16>
    %61 = vector.extract_strided_slice %46 {offsets = [0, 0], sizes = [8, 16], strides = [1, 1]} : vector<16x16xbf16> to vector<8x16xbf16>
    %cst_26 = arith.constant dense<0.000000e+00> : vector<8x16xf32>
    %62 = tpu.matmul %60, %61, %cst_26 {dimension_numbers = #tpu.dot_dimension_numbers<[1], [0], [0], [1], [0, 0, 1, 1], [], []>} : vector<8x8xbf16>, vector<8x16xbf16>, vector<8x16xf32> -> vector<8x16xf32>
    %63 = vector.extract_strided_slice %38 {offsets = [8, 0], sizes = [8, 16], strides = [1, 1]} : vector<16x16xbf16> to vector<8x16xbf16>
    %64 = vector.extract_strided_slice %42 {offsets = [8, 0], sizes = [8, 16], strides = [1, 1]} : vector<16x16xbf16> to vector<8x16xbf16>
    %cst_27 = arith.constant dense<0.000000e+00> : vector<8x8xf32>
    %65 = tpu.matmul %63, %64, %cst_27 {dimension_numbers = #tpu.dot_dimension_numbers<[1], [1], [0], [0], [0, 0, 1, 0], [], []>} : vector<8x16xbf16>, vector<8x16xbf16>, vector<8x8xf32> -> vector<8x8xf32>
    %cst_28 = arith.constant dense<0xFF800000> : vector<8xf32>
    %66 = vector.multi_reduction <maximumf>, %65, %cst_28 [1] : vector<8x8xf32> to vector<8xf32>
    %67 = vector.shape_cast %66 : vector<8xf32> to vector<8x1xf32>
    %68 = vector.broadcast %67 : vector<8x1xf32> to vector<8x8xf32>
    %69 = arith.subf %65, %68 : vector<8x8xf32>
    %70 = math.exp %69 : vector<8x8xf32>
    %cst_29 = arith.constant dense<0.000000e+00> : vector<8xf32>
    %71 = vector.multi_reduction <add>, %70, %cst_29 [1] : vector<8x8xf32> to vector<8xf32>
    %72 = vector.shape_cast %71 : vector<8xf32> to vector<8x1xf32>
    %73 = tpu.reciprocal %72 {approx = true} : vector<8x1xf32> -> vector<8x1xf32>
    %74 = vector.broadcast %73 : vector<8x1xf32> to vector<8x8xf32>
    %75 = arith.mulf %70, %74 : vector<8x8xf32>
    %76 = arith.truncf %75 : vector<8x8xf32> to vector<8x8xbf16>
    %77 = vector.extract_strided_slice %46 {offsets = [8, 0], sizes = [8, 16], strides = [1, 1]} : vector<16x16xbf16> to vector<8x16xbf16>
    %cst_30 = arith.constant dense<0.000000e+00> : vector<8x16xf32>
    %78 = tpu.matmul %76, %77, %cst_30 {dimension_numbers = #tpu.dot_dimension_numbers<[1], [0], [0], [1], [0, 0, 1, 1], [], []>} : vector<8x8xbf16>, vector<8x16xbf16>, vector<8x16xf32> -> vector<8x16xf32>
    %79 = tpu.concatenate %62, %78 in 0 : vector<8x16xf32>, vector<8x16xf32> -> vector<16x16xf32>
    %80 = arith.truncf %79 : vector<16x16xf32> to vector<16x16xbf16>
    %c0_31 = arith.constant 0 : index
    %c0_32 = arith.constant 0 : index
    %c0_33 = arith.constant 0 : index
    %c0_34 = arith.constant 0 : index
    %81 = vector.load %arg5[%c0_31, %c0_32, %c0_33, %c0_34] : memref<1x4x16x32xbf16, #tpu.memory_space<vmem>>, vector<1x1x16x32xbf16>
    %82 = vector.shape_cast %81 : vector<1x1x16x32xbf16> to vector<16x32xbf16>
    %cst_35 = arith.constant dense<0.000000e+00> : vector<16x32xf32>
    %83 = tpu.matmul %80, %82, %cst_35 {dimension_numbers = #tpu.dot_dimension_numbers<[1], [0], [0], [1], [0, 0, 1, 1], [], []>} : vector<16x16xbf16>, vector<16x32xbf16>, vector<16x32xf32> -> vector<16x32xf32>
    %84 = arith.addf %34, %83 : vector<16x32xf32>
    %c0_36 = arith.constant 0 : index
    %c1 = arith.constant 1 : index
    %c0_37 = arith.constant 0 : index
    %c0_38 = arith.constant 0 : index
    %85 = vector.load %arg4[%c0_36, %c1, %c0_37, %c0_38] : memref<1x12x32x16xbf16, #tpu.memory_space<vmem>>, vector<1x1x32x16xbf16>
    %86 = vector.shape_cast %85 : vector<1x1x32x16xbf16> to vector<32x16xbf16>
    %cst_39 = arith.constant dense<0.000000e+00> : vector<16x16xf32>
    %87 = tpu.matmul %33, %86, %cst_39 {dimension_numbers = #tpu.dot_dimension_numbers<[1], [0], [0], [1], [0, 0, 1, 1], [], []>} : vector<16x32xbf16>, vector<32x16xbf16>, vector<16x16xf32> -> vector<16x16xf32>
    %88 = arith.truncf %87 : vector<16x16xf32> to vector<16x16xbf16>
    %c0_40 = arith.constant 0 : index
    %c5 = arith.constant 5 : index
    %c0_41 = arith.constant 0 : index
    %c0_42 = arith.constant 0 : index
    %89 = vector.load %arg4[%c0_40, %c5, %c0_41, %c0_42] : memref<1x12x32x16xbf16, #tpu.memory_space<vmem>>, vector<1x1x32x16xbf16>
    %90 = vector.shape_cast %89 : vector<1x1x32x16xbf16> to vector<32x16xbf16>
    %cst_43 = arith.constant dense<0.000000e+00> : vector<16x16xf32>
    %91 = tpu.matmul %33, %90, %cst_43 {dimension_numbers = #tpu.dot_dimension_numbers<[1], [0], [0], [1], [0, 0, 1, 1], [], []>} : vector<16x32xbf16>, vector<32x16xbf16>, vector<16x16xf32> -> vector<16x16xf32>
    %92 = arith.truncf %91 : vector<16x16xf32> to vector<16x16xbf16>
    %c0_44 = arith.constant 0 : index
    %c9 = arith.constant 9 : index
    %c0_45 = arith.constant 0 : index
    %c0_46 = arith.constant 0 : index
    %93 = vector.load %arg4[%c0_44, %c9, %c0_45, %c0_46] : memref<1x12x32x16xbf16, #tpu.memory_space<vmem>>, vector<1x1x32x16xbf16>
    %94 = vector.shape_cast %93 : vector<1x1x32x16xbf16> to vector<32x16xbf16>
    %cst_47 = arith.constant dense<0.000000e+00> : vector<16x16xf32>
    %95 = tpu.matmul %33, %94, %cst_47 {dimension_numbers = #tpu.dot_dimension_numbers<[1], [0], [0], [1], [0, 0, 1, 1], [], []>} : vector<16x32xbf16>, vector<32x16xbf16>, vector<16x16xf32> -> vector<16x16xf32>
    %96 = arith.truncf %95 : vector<16x16xf32> to vector<16x16xbf16>
    %97 = vector.extract_strided_slice %88 {offsets = [0, 0], sizes = [8, 16], strides = [1, 1]} : vector<16x16xbf16> to vector<8x16xbf16>
    %98 = vector.extract_strided_slice %92 {offsets = [0, 0], sizes = [8, 16], strides = [1, 1]} : vector<16x16xbf16> to vector<8x16xbf16>
    %cst_48 = arith.constant dense<0.000000e+00> : vector<8x8xf32>
    %99 = tpu.matmul %97, %98, %cst_48 {dimension_numbers = #tpu.dot_dimension_numbers<[1], [1], [0], [0], [0, 0, 1, 0], [], []>} : vector<8x16xbf16>, vector<8x16xbf16>, vector<8x8xf32> -> vector<8x8xf32>
    %cst_49 = arith.constant dense<0xFF800000> : vector<8xf32>
    %100 = vector.multi_reduction <maximumf>, %99, %cst_49 [1] : vector<8x8xf32> to vector<8xf32>
    %101 = vector.shape_cast %100 : vector<8xf32> to vector<8x1xf32>
    %102 = vector.broadcast %101 : vector<8x1xf32> to vector<8x8xf32>
    %103 = arith.subf %99, %102 : vector<8x8xf32>
    %104 = math.exp %103 : vector<8x8xf32>
    %cst_50 = arith.constant dense<0.000000e+00> : vector<8xf32>
    %105 = vector.multi_reduction <add>, %104, %cst_50 [1] : vector<8x8xf32> to vector<8xf32>
    %106 = vector.shape_cast %105 : vector<8xf32> to vector<8x1xf32>
    %107 = tpu.reciprocal %106 {approx = true} : vector<8x1xf32> -> vector<8x1xf32>
    %108 = vector.broadcast %107 : vector<8x1xf32> to vector<8x8xf32>
    %109 = arith.mulf %104, %108 : vector<8x8xf32>
    %110 = arith.truncf %109 : vector<8x8xf32> to vector<8x8xbf16>
    %111 = vector.extract_strided_slice %96 {offsets = [0, 0], sizes = [8, 16], strides = [1, 1]} : vector<16x16xbf16> to vector<8x16xbf16>
    %cst_51 = arith.constant dense<0.000000e+00> : vector<8x16xf32>
    %112 = tpu.matmul %110, %111, %cst_51 {dimension_numbers = #tpu.dot_dimension_numbers<[1], [0], [0], [1], [0, 0, 1, 1], [], []>} : vector<8x8xbf16>, vector<8x16xbf16>, vector<8x16xf32> -> vector<8x16xf32>
    %113 = vector.extract_strided_slice %88 {offsets = [8, 0], sizes = [8, 16], strides = [1, 1]} : vector<16x16xbf16> to vector<8x16xbf16>
    %114 = vector.extract_strided_slice %92 {offsets = [8, 0], sizes = [8, 16], strides = [1, 1]} : vector<16x16xbf16> to vector<8x16xbf16>
    %cst_52 = arith.constant dense<0.000000e+00> : vector<8x8xf32>
    %115 = tpu.matmul %113, %114, %cst_52 {dimension_numbers = #tpu.dot_dimension_numbers<[1], [1], [0], [0], [0, 0, 1, 0], [], []>} : vector<8x16xbf16>, vector<8x16xbf16>, vector<8x8xf32> -> vector<8x8xf32>
    %cst_53 = arith.constant dense<0xFF800000> : vector<8xf32>
    %116 = vector.multi_reduction <maximumf>, %115, %cst_53 [1] : vector<8x8xf32> to vector<8xf32>
    %117 = vector.shape_cast %116 : vector<8xf32> to vector<8x1xf32>
    %118 = vector.broadcast %117 : vector<8x1xf32> to vector<8x8xf32>
    %119 = arith.subf %115, %118 : vector<8x8xf32>
    %120 = math.exp %119 : vector<8x8xf32>
    %cst_54 = arith.constant dense<0.000000e+00> : vector<8xf32>
    %121 = vector.multi_reduction <add>, %120, %cst_54 [1] : vector<8x8xf32> to vector<8xf32>
    %122 = vector.shape_cast %121 : vector<8xf32> to vector<8x1xf32>
    %123 = tpu.reciprocal %122 {approx = true} : vector<8x1xf32> -> vector<8x1xf32>
    %124 = vector.broadcast %123 : vector<8x1xf32> to vector<8x8xf32>
    %125 = arith.mulf %120, %124 : vector<8x8xf32>
    %126 = arith.truncf %125 : vector<8x8xf32> to vector<8x8xbf16>
    %127 = vector.extract_strided_slice %96 {offsets = [8, 0], sizes = [8, 16], strides = [1, 1]} : vector<16x16xbf16> to vector<8x16xbf16>
    %cst_55 = arith.constant dense<0.000000e+00> : vector<8x16xf32>
    %128 = tpu.matmul %126, %127, %cst_55 {dimension_numbers = #tpu.dot_dimension_numbers<[1], [0], [0], [1], [0, 0, 1, 1], [], []>} : vector<8x8xbf16>, vector<8x16xbf16>, vector<8x16xf32> -> vector<8x16xf32>
    %129 = tpu.concatenate %112, %128 in 0 : vector<8x16xf32>, vector<8x16xf32> -> vector<16x16xf32>
    %130 = arith.truncf %129 : vector<16x16xf32> to vector<16x16xbf16>
    %c0_56 = arith.constant 0 : index
    %c1_57 = arith.constant 1 : index
    %c0_58 = arith.constant 0 : index
    %c0_59 = arith.constant 0 : index
    %131 = vector.load %arg5[%c0_56, %c1_57, %c0_58, %c0_59] : memref<1x4x16x32xbf16, #tpu.memory_space<vmem>>, vector<1x1x16x32xbf16>
    %132 = vector.shape_cast %131 : vector<1x1x16x32xbf16> to vector<16x32xbf16>
    %cst_60 = arith.constant dense<0.000000e+00> : vector<16x32xf32>
    %133 = tpu.matmul %130, %132, %cst_60 {dimension_numbers = #tpu.dot_dimension_numbers<[1], [0], [0], [1], [0, 0, 1, 1], [], []>} : vector<16x16xbf16>, vector<16x32xbf16>, vector<16x32xf32> -> vector<16x32xf32>
    %134 = arith.addf %84, %133 : vector<16x32xf32>
    %c0_61 = arith.constant 0 : index
    %c2 = arith.constant 2 : index
    %c0_62 = arith.constant 0 : index
    %c0_63 = arith.constant 0 : index
    %135 = vector.load %arg4[%c0_61, %c2, %c0_62, %c0_63] : memref<1x12x32x16xbf16, #tpu.memory_space<vmem>>, vector<1x1x32x16xbf16>
    %136 = vector.shape_cast %135 : vector<1x1x32x16xbf16> to vector<32x16xbf16>
    %cst_64 = arith.constant dense<0.000000e+00> : vector<16x16xf32>
    %137 = tpu.matmul %33, %136, %cst_64 {dimension_numbers = #tpu.dot_dimension_numbers<[1], [0], [0], [1], [0, 0, 1, 1], [], []>} : vector<16x32xbf16>, vector<32x16xbf16>, vector<16x16xf32> -> vector<16x16xf32>
    %138 = arith.truncf %137 : vector<16x16xf32> to vector<16x16xbf16>
    %c0_65 = arith.constant 0 : index
    %c6 = arith.constant 6 : index
    %c0_66 = arith.constant 0 : index
    %c0_67 = arith.constant 0 : index
    %139 = vector.load %arg4[%c0_65, %c6, %c0_66, %c0_67] : memref<1x12x32x16xbf16, #tpu.memory_space<vmem>>, vector<1x1x32x16xbf16>
    %140 = vector.shape_cast %139 : vector<1x1x32x16xbf16> to vector<32x16xbf16>
    %cst_68 = arith.constant dense<0.000000e+00> : vector<16x16xf32>
    %141 = tpu.matmul %33, %140, %cst_68 {dimension_numbers = #tpu.dot_dimension_numbers<[1], [0], [0], [1], [0, 0, 1, 1], [], []>} : vector<16x32xbf16>, vector<32x16xbf16>, vector<16x16xf32> -> vector<16x16xf32>
    %142 = arith.truncf %141 : vector<16x16xf32> to vector<16x16xbf16>
    %c0_69 = arith.constant 0 : index
    %c10 = arith.constant 10 : index
    %c0_70 = arith.constant 0 : index
    %c0_71 = arith.constant 0 : index
    %143 = vector.load %arg4[%c0_69, %c10, %c0_70, %c0_71] : memref<1x12x32x16xbf16, #tpu.memory_space<vmem>>, vector<1x1x32x16xbf16>
    %144 = vector.shape_cast %143 : vector<1x1x32x16xbf16> to vector<32x16xbf16>
    %cst_72 = arith.constant dense<0.000000e+00> : vector<16x16xf32>
    %145 = tpu.matmul %33, %144, %cst_72 {dimension_numbers = #tpu.dot_dimension_numbers<[1], [0], [0], [1], [0, 0, 1, 1], [], []>} : vector<16x32xbf16>, vector<32x16xbf16>, vector<16x16xf32> -> vector<16x16xf32>
    %146 = arith.truncf %145 : vector<16x16xf32> to vector<16x16xbf16>
    %147 = vector.extract_strided_slice %138 {offsets = [0, 0], sizes = [8, 16], strides = [1, 1]} : vector<16x16xbf16> to vector<8x16xbf16>
    %148 = vector.extract_strided_slice %142 {offsets = [0, 0], sizes = [8, 16], strides = [1, 1]} : vector<16x16xbf16> to vector<8x16xbf16>
    %cst_73 = arith.constant dense<0.000000e+00> : vector<8x8xf32>
    %149 = tpu.matmul %147, %148, %cst_73 {dimension_numbers = #tpu.dot_dimension_numbers<[1], [1], [0], [0], [0, 0, 1, 0], [], []>} : vector<8x16xbf16>, vector<8x16xbf16>, vector<8x8xf32> -> vector<8x8xf32>
    %cst_74 = arith.constant dense<0xFF800000> : vector<8xf32>
    %150 = vector.multi_reduction <maximumf>, %149, %cst_74 [1] : vector<8x8xf32> to vector<8xf32>
    %151 = vector.shape_cast %150 : vector<8xf32> to vector<8x1xf32>
    %152 = vector.broadcast %151 : vector<8x1xf32> to vector<8x8xf32>
    %153 = arith.subf %149, %152 : vector<8x8xf32>
    %154 = math.exp %153 : vector<8x8xf32>
    %cst_75 = arith.constant dense<0.000000e+00> : vector<8xf32>
    %155 = vector.multi_reduction <add>, %154, %cst_75 [1] : vector<8x8xf32> to vector<8xf32>
    %156 = vector.shape_cast %155 : vector<8xf32> to vector<8x1xf32>
    %157 = tpu.reciprocal %156 {approx = true} : vector<8x1xf32> -> vector<8x1xf32>
    %158 = vector.broadcast %157 : vector<8x1xf32> to vector<8x8xf32>
    %159 = arith.mulf %154, %158 : vector<8x8xf32>
    %160 = arith.truncf %159 : vector<8x8xf32> to vector<8x8xbf16>
    %161 = vector.extract_strided_slice %146 {offsets = [0, 0], sizes = [8, 16], strides = [1, 1]} : vector<16x16xbf16> to vector<8x16xbf16>
    %cst_76 = arith.constant dense<0.000000e+00> : vector<8x16xf32>
    %162 = tpu.matmul %160, %161, %cst_76 {dimension_numbers = #tpu.dot_dimension_numbers<[1], [0], [0], [1], [0, 0, 1, 1], [], []>} : vector<8x8xbf16>, vector<8x16xbf16>, vector<8x16xf32> -> vector<8x16xf32>
    %163 = vector.extract_strided_slice %138 {offsets = [8, 0], sizes = [8, 16], strides = [1, 1]} : vector<16x16xbf16> to vector<8x16xbf16>
    %164 = vector.extract_strided_slice %142 {offsets = [8, 0], sizes = [8, 16], strides = [1, 1]} : vector<16x16xbf16> to vector<8x16xbf16>
    %cst_77 = arith.constant dense<0.000000e+00> : vector<8x8xf32>
    %165 = tpu.matmul %163, %164, %cst_77 {dimension_numbers = #tpu.dot_dimension_numbers<[1], [1], [0], [0], [0, 0, 1, 0], [], []>} : vector<8x16xbf16>, vector<8x16xbf16>, vector<8x8xf32> -> vector<8x8xf32>
    %cst_78 = arith.constant dense<0xFF800000> : vector<8xf32>
    %166 = vector.multi_reduction <maximumf>, %165, %cst_78 [1] : vector<8x8xf32> to vector<8xf32>
    %167 = vector.shape_cast %166 : vector<8xf32> to vector<8x1xf32>
    %168 = vector.broadcast %167 : vector<8x1xf32> to vector<8x8xf32>
    %169 = arith.subf %165, %168 : vector<8x8xf32>
    %170 = math.exp %169 : vector<8x8xf32>
    %cst_79 = arith.constant dense<0.000000e+00> : vector<8xf32>
    %171 = vector.multi_reduction <add>, %170, %cst_79 [1] : vector<8x8xf32> to vector<8xf32>
    %172 = vector.shape_cast %171 : vector<8xf32> to vector<8x1xf32>
    %173 = tpu.reciprocal %172 {approx = true} : vector<8x1xf32> -> vector<8x1xf32>
    %174 = vector.broadcast %173 : vector<8x1xf32> to vector<8x8xf32>
    %175 = arith.mulf %170, %174 : vector<8x8xf32>
    %176 = arith.truncf %175 : vector<8x8xf32> to vector<8x8xbf16>
    %177 = vector.extract_strided_slice %146 {offsets = [8, 0], sizes = [8, 16], strides = [1, 1]} : vector<16x16xbf16> to vector<8x16xbf16>
    %cst_80 = arith.constant dense<0.000000e+00> : vector<8x16xf32>
    %178 = tpu.matmul %176, %177, %cst_80 {dimension_numbers = #tpu.dot_dimension_numbers<[1], [0], [0], [1], [0, 0, 1, 1], [], []>} : vector<8x8xbf16>, vector<8x16xbf16>, vector<8x16xf32> -> vector<8x16xf32>
    %179 = tpu.concatenate %162, %178 in 0 : vector<8x16xf32>, vector<8x16xf32> -> vector<16x16xf32>
    %180 = arith.truncf %179 : vector<16x16xf32> to vector<16x16xbf16>
    %c0_81 = arith.constant 0 : index
    %c2_82 = arith.constant 2 : index
    %c0_83 = arith.constant 0 : index
    %c0_84 = arith.constant 0 : index
    %181 = vector.load %arg5[%c0_81, %c2_82, %c0_83, %c0_84] : memref<1x4x16x32xbf16, #tpu.memory_space<vmem>>, vector<1x1x16x32xbf16>
    %182 = vector.shape_cast %181 : vector<1x1x16x32xbf16> to vector<16x32xbf16>
    %cst_85 = arith.constant dense<0.000000e+00> : vector<16x32xf32>
    %183 = tpu.matmul %180, %182, %cst_85 {dimension_numbers = #tpu.dot_dimension_numbers<[1], [0], [0], [1], [0, 0, 1, 1], [], []>} : vector<16x16xbf16>, vector<16x32xbf16>, vector<16x32xf32> -> vector<16x32xf32>
    %184 = arith.addf %134, %183 : vector<16x32xf32>
    %c0_86 = arith.constant 0 : index
    %c3 = arith.constant 3 : index
    %c0_87 = arith.constant 0 : index
    %c0_88 = arith.constant 0 : index
    %185 = vector.load %arg4[%c0_86, %c3, %c0_87, %c0_88] : memref<1x12x32x16xbf16, #tpu.memory_space<vmem>>, vector<1x1x32x16xbf16>
    %186 = vector.shape_cast %185 : vector<1x1x32x16xbf16> to vector<32x16xbf16>
    %cst_89 = arith.constant dense<0.000000e+00> : vector<16x16xf32>
    %187 = tpu.matmul %33, %186, %cst_89 {dimension_numbers = #tpu.dot_dimension_numbers<[1], [0], [0], [1], [0, 0, 1, 1], [], []>} : vector<16x32xbf16>, vector<32x16xbf16>, vector<16x16xf32> -> vector<16x16xf32>
    %188 = arith.truncf %187 : vector<16x16xf32> to vector<16x16xbf16>
    %c0_90 = arith.constant 0 : index
    %c7 = arith.constant 7 : index
    %c0_91 = arith.constant 0 : index
    %c0_92 = arith.constant 0 : index
    %189 = vector.load %arg4[%c0_90, %c7, %c0_91, %c0_92] : memref<1x12x32x16xbf16, #tpu.memory_space<vmem>>, vector<1x1x32x16xbf16>
    %190 = vector.shape_cast %189 : vector<1x1x32x16xbf16> to vector<32x16xbf16>
    %cst_93 = arith.constant dense<0.000000e+00> : vector<16x16xf32>
    %191 = tpu.matmul %33, %190, %cst_93 {dimension_numbers = #tpu.dot_dimension_numbers<[1], [0], [0], [1], [0, 0, 1, 1], [], []>} : vector<16x32xbf16>, vector<32x16xbf16>, vector<16x16xf32> -> vector<16x16xf32>
    %192 = arith.truncf %191 : vector<16x16xf32> to vector<16x16xbf16>
    %c0_94 = arith.constant 0 : index
    %c11 = arith.constant 11 : index
    %c0_95 = arith.constant 0 : index
    %c0_96 = arith.constant 0 : index
    %193 = vector.load %arg4[%c0_94, %c11, %c0_95, %c0_96] : memref<1x12x32x16xbf16, #tpu.memory_space<vmem>>, vector<1x1x32x16xbf16>
    %194 = vector.shape_cast %193 : vector<1x1x32x16xbf16> to vector<32x16xbf16>
    %cst_97 = arith.constant dense<0.000000e+00> : vector<16x16xf32>
    %195 = tpu.matmul %33, %194, %cst_97 {dimension_numbers = #tpu.dot_dimension_numbers<[1], [0], [0], [1], [0, 0, 1, 1], [], []>} : vector<16x32xbf16>, vector<32x16xbf16>, vector<16x16xf32> -> vector<16x16xf32>
    %196 = arith.truncf %195 : vector<16x16xf32> to vector<16x16xbf16>
    %197 = vector.extract_strided_slice %188 {offsets = [0, 0], sizes = [8, 16], strides = [1, 1]} : vector<16x16xbf16> to vector<8x16xbf16>
    %198 = vector.extract_strided_slice %192 {offsets = [0, 0], sizes = [8, 16], strides = [1, 1]} : vector<16x16xbf16> to vector<8x16xbf16>
    %cst_98 = arith.constant dense<0.000000e+00> : vector<8x8xf32>
    %199 = tpu.matmul %197, %198, %cst_98 {dimension_numbers = #tpu.dot_dimension_numbers<[1], [1], [0], [0], [0, 0, 1, 0], [], []>} : vector<8x16xbf16>, vector<8x16xbf16>, vector<8x8xf32> -> vector<8x8xf32>
    %cst_99 = arith.constant dense<0xFF800000> : vector<8xf32>
    %200 = vector.multi_reduction <maximumf>, %199, %cst_99 [1] : vector<8x8xf32> to vector<8xf32>
    %201 = vector.shape_cast %200 : vector<8xf32> to vector<8x1xf32>
    %202 = vector.broadcast %201 : vector<8x1xf32> to vector<8x8xf32>
    %203 = arith.subf %199, %202 : vector<8x8xf32>
    %204 = math.exp %203 : vector<8x8xf32>
    %cst_100 = arith.constant dense<0.000000e+00> : vector<8xf32>
    %205 = vector.multi_reduction <add>, %204, %cst_100 [1] : vector<8x8xf32> to vector<8xf32>
    %206 = vector.shape_cast %205 : vector<8xf32> to vector<8x1xf32>
    %207 = tpu.reciprocal %206 {approx = true} : vector<8x1xf32> -> vector<8x1xf32>
    %208 = vector.broadcast %207 : vector<8x1xf32> to vector<8x8xf32>
    %209 = arith.mulf %204, %208 : vector<8x8xf32>
    %210 = arith.truncf %209 : vector<8x8xf32> to vector<8x8xbf16>
    %211 = vector.extract_strided_slice %196 {offsets = [0, 0], sizes = [8, 16], strides = [1, 1]} : vector<16x16xbf16> to vector<8x16xbf16>
    %cst_101 = arith.constant dense<0.000000e+00> : vector<8x16xf32>
    %212 = tpu.matmul %210, %211, %cst_101 {dimension_numbers = #tpu.dot_dimension_numbers<[1], [0], [0], [1], [0, 0, 1, 1], [], []>} : vector<8x8xbf16>, vector<8x16xbf16>, vector<8x16xf32> -> vector<8x16xf32>
    %213 = vector.extract_strided_slice %188 {offsets = [8, 0], sizes = [8, 16], strides = [1, 1]} : vector<16x16xbf16> to vector<8x16xbf16>
    %214 = vector.extract_strided_slice %192 {offsets = [8, 0], sizes = [8, 16], strides = [1, 1]} : vector<16x16xbf16> to vector<8x16xbf16>
    %cst_102 = arith.constant dense<0.000000e+00> : vector<8x8xf32>
    %215 = tpu.matmul %213, %214, %cst_102 {dimension_numbers = #tpu.dot_dimension_numbers<[1], [1], [0], [0], [0, 0, 1, 0], [], []>} : vector<8x16xbf16>, vector<8x16xbf16>, vector<8x8xf32> -> vector<8x8xf32>
    %cst_103 = arith.constant dense<0xFF800000> : vector<8xf32>
    %216 = vector.multi_reduction <maximumf>, %215, %cst_103 [1] : vector<8x8xf32> to vector<8xf32>
    %217 = vector.shape_cast %216 : vector<8xf32> to vector<8x1xf32>
    %218 = vector.broadcast %217 : vector<8x1xf32> to vector<8x8xf32>
    %219 = arith.subf %215, %218 : vector<8x8xf32>
    %220 = math.exp %219 : vector<8x8xf32>
    %cst_104 = arith.constant dense<0.000000e+00> : vector<8xf32>
    %221 = vector.multi_reduction <add>, %220, %cst_104 [1] : vector<8x8xf32> to vector<8xf32>
    %222 = vector.shape_cast %221 : vector<8xf32> to vector<8x1xf32>
    %223 = tpu.reciprocal %222 {approx = true} : vector<8x1xf32> -> vector<8x1xf32>
    %224 = vector.broadcast %223 : vector<8x1xf32> to vector<8x8xf32>
    %225 = arith.mulf %220, %224 : vector<8x8xf32>
    %226 = arith.truncf %225 : vector<8x8xf32> to vector<8x8xbf16>
    %227 = vector.extract_strided_slice %196 {offsets = [8, 0], sizes = [8, 16], strides = [1, 1]} : vector<16x16xbf16> to vector<8x16xbf16>
    %cst_105 = arith.constant dense<0.000000e+00> : vector<8x16xf32>
    %228 = tpu.matmul %226, %227, %cst_105 {dimension_numbers = #tpu.dot_dimension_numbers<[1], [0], [0], [1], [0, 0, 1, 1], [], []>} : vector<8x8xbf16>, vector<8x16xbf16>, vector<8x16xf32> -> vector<8x16xf32>
    %229 = tpu.concatenate %212, %228 in 0 : vector<8x16xf32>, vector<8x16xf32> -> vector<16x16xf32>
    %230 = arith.truncf %229 : vector<16x16xf32> to vector<16x16xbf16>
    %c0_106 = arith.constant 0 : index
    %c3_107 = arith.constant 3 : index
    %c0_108 = arith.constant 0 : index
    %c0_109 = arith.constant 0 : index
    %231 = vector.load %arg5[%c0_106, %c3_107, %c0_108, %c0_109] : memref<1x4x16x32xbf16, #tpu.memory_space<vmem>>, vector<1x1x16x32xbf16>
    %232 = vector.shape_cast %231 : vector<1x1x16x32xbf16> to vector<16x32xbf16>
    %cst_110 = arith.constant dense<0.000000e+00> : vector<16x32xf32>
    %233 = tpu.matmul %230, %232, %cst_110 {dimension_numbers = #tpu.dot_dimension_numbers<[1], [0], [0], [1], [0, 0, 1, 1], [], []>} : vector<16x16xbf16>, vector<16x32xbf16>, vector<16x32xf32> -> vector<16x32xf32>
    %234 = arith.addf %184, %233 : vector<16x32xf32>
    %235 = arith.addf %12, %234 : vector<16x32xf32>
    %236 = vector.broadcast %7 : vector<1x32xf32> to vector<16x32xf32>
    %237 = arith.addf %235, %236 : vector<16x32xf32>
    %cst_111 = arith.constant dense<0.000000e+00> : vector<16xf32>
    %238 = vector.multi_reduction <add>, %237, %cst_111 [1] : vector<16x32xf32> to vector<16xf32>
    %239 = vector.shape_cast %238 : vector<16xf32> to vector<16x1xf32>
    %cst_112 = arith.constant 3.200000e+01 : f32
    %240 = vector.broadcast %cst_112 : f32 to vector<16x1xf32>
    %241 = arith.divf %239, %240 : vector<16x1xf32>
    %242 = vector.broadcast %241 : vector<16x1xf32> to vector<16x32xf32>
    %243 = arith.subf %237, %242 : vector<16x32xf32>
    %244 = arith.mulf %243, %243 : vector<16x32xf32>
    %cst_113 = arith.constant dense<0.000000e+00> : vector<16xf32>
    %245 = vector.multi_reduction <add>, %244, %cst_113 [1] : vector<16x32xf32> to vector<16xf32>
    %246 = vector.shape_cast %245 : vector<16xf32> to vector<16x1xf32>
    %cst_114 = arith.constant 3.200000e+01 : f32
    %247 = vector.broadcast %cst_114 : f32 to vector<16x1xf32>
    %248 = arith.divf %246, %247 : vector<16x1xf32>
    %cst_115 = arith.constant 9.99999974E-6 : f32
    %249 = vector.broadcast %cst_115 : f32 to vector<16x1xf32>
    %250 = arith.addf %248, %249 : vector<16x1xf32>
    %251 = math.rsqrt %250 : vector<16x1xf32>
    %252 = vector.broadcast %251 : vector<16x1xf32> to vector<16x32xf32>
    %253 = arith.mulf %243, %252 : vector<16x32xf32>
    %254 = vector.broadcast %8 : vector<1x32xf32> to vector<16x32xf32>
    %255 = arith.mulf %253, %254 : vector<16x32xf32>
    %256 = vector.broadcast %9 : vector<1x32xf32> to vector<16x32xf32>
    %257 = arith.addf %255, %256 : vector<16x32xf32>
    %258 = arith.truncf %257 : vector<16x32xf32> to vector<16x32xbf16>
    %c0_116 = arith.constant 0 : index
    %c0_117 = arith.constant 0 : index
    %c0_118 = arith.constant 0 : index
    %259 = vector.load %arg6[%c0_116, %c0_117, %c0_118] : memref<1x32x64xbf16, #tpu.memory_space<vmem>>, vector<1x32x64xbf16>
    %260 = vector.shape_cast %259 : vector<1x32x64xbf16> to vector<32x64xbf16>
    %cst_119 = arith.constant dense<0.000000e+00> : vector<16x64xf32>
    %261 = tpu.matmul %258, %260, %cst_119 {dimension_numbers = #tpu.dot_dimension_numbers<[1], [0], [0], [1], [0, 0, 1, 1], [], []>} : vector<16x32xbf16>, vector<32x64xbf16>, vector<16x64xf32> -> vector<16x64xf32>
    %262 = vector.broadcast %11 : vector<1x64xf32> to vector<16x64xf32>
    %263 = arith.addf %261, %262 : vector<16x64xf32>
    %cst_120 = arith.constant 5.000000e-01 : f32
    %264 = vector.broadcast %cst_120 : f32 to vector<16x64xf32>
    %265 = arith.mulf %264, %263 : vector<16x64xf32>
    %cst_121 = arith.constant 0.707106769 : f32
    %266 = vector.broadcast %cst_121 : f32 to vector<16x64xf32>
    %267 = arith.mulf %263, %266 : vector<16x64xf32>
    %268 = math.absf %267 : vector<16x64xf32>
    %cst_122 = arith.constant 0.327591091 : f32
    %269 = vector.broadcast %cst_122 : f32 to vector<16x64xf32>
    %270 = arith.mulf %269, %268 : vector<16x64xf32>
    %cst_123 = arith.constant 1.000000e+00 : f32
    %271 = vector.broadcast %cst_123 : f32 to vector<16x64xf32>
    %272 = arith.addf %271, %270 : vector<16x64xf32>
    %cst_124 = arith.constant 1.000000e+00 : f32
    %273 = vector.broadcast %cst_124 : f32 to vector<16x64xf32>
    %274 = arith.divf %273, %272 : vector<16x64xf32>
    %cst_125 = arith.constant 1.06140542 : f32
    %275 = vector.broadcast %cst_125 : f32 to vector<16x64xf32>
    %276 = arith.mulf %275, %274 : vector<16x64xf32>
    %cst_126 = arith.constant -1.45315206 : f32
    %277 = vector.broadcast %cst_126 : f32 to vector<16x64xf32>
    %278 = arith.addf %276, %277 : vector<16x64xf32>
    %279 = arith.mulf %278, %274 : vector<16x64xf32>
    %cst_127 = arith.constant 1.42141378 : f32
    %280 = vector.broadcast %cst_127 : f32 to vector<16x64xf32>
    %281 = arith.addf %279, %280 : vector<16x64xf32>
    %282 = arith.mulf %281, %274 : vector<16x64xf32>
    %cst_128 = arith.constant -0.284496725 : f32
    %283 = vector.broadcast %cst_128 : f32 to vector<16x64xf32>
    %284 = arith.addf %282, %283 : vector<16x64xf32>
    %285 = arith.mulf %284, %274 : vector<16x64xf32>
    %cst_129 = arith.constant 0.254829586 : f32
    %286 = vector.broadcast %cst_129 : f32 to vector<16x64xf32>
    %287 = arith.addf %285, %286 : vector<16x64xf32>
    %288 = arith.mulf %287, %274 : vector<16x64xf32>
    %cst_130 = arith.constant 0.000000e+00 : f32
    %289 = vector.broadcast %cst_130 : f32 to vector<16x64xf32>
    %290 = arith.subf %289, %268 : vector<16x64xf32>
    %291 = arith.mulf %290, %268 : vector<16x64xf32>
    %292 = math.exp %291 : vector<16x64xf32>
    %293 = arith.mulf %288, %292 : vector<16x64xf32>
    %cst_131 = arith.constant 1.000000e+00 : f32
    %294 = vector.broadcast %cst_131 : f32 to vector<16x64xf32>
    %295 = arith.subf %294, %293 : vector<16x64xf32>
    %cst_132 = arith.constant 0.000000e+00 : f32
    %296 = vector.broadcast %cst_132 : f32 to vector<16x64xf32>
    %297 = arith.cmpf oge, %267, %296 : vector<16x64xf32>
    %cst_133 = arith.constant 0.000000e+00 : f32
    %298 = vector.broadcast %cst_133 : f32 to vector<16x64xf32>
    %299 = arith.subf %298, %295 : vector<16x64xf32>
    %300 = arith.select %297, %295, %299 : vector<16x64xi1>, vector<16x64xf32>
    %cst_134 = arith.constant 1.000000e+00 : f32
    %301 = vector.broadcast %cst_134 : f32 to vector<16x64xf32>
    %302 = arith.addf %301, %300 : vector<16x64xf32>
    %303 = arith.mulf %265, %302 : vector<16x64xf32>
    %304 = arith.truncf %303 : vector<16x64xf32> to vector<16x64xbf16>
    %c0_135 = arith.constant 0 : index
    %c0_136 = arith.constant 0 : index
    %c0_137 = arith.constant 0 : index
    %305 = vector.load %arg7[%c0_135, %c0_136, %c0_137] : memref<1x64x32xbf16, #tpu.memory_space<vmem>>, vector<1x64x32xbf16>
    %306 = vector.shape_cast %305 : vector<1x64x32xbf16> to vector<64x32xbf16>
    %cst_138 = arith.constant dense<0.000000e+00> : vector<16x32xf32>
    %307 = tpu.matmul %304, %306, %cst_138 {dimension_numbers = #tpu.dot_dimension_numbers<[1], [0], [0], [1], [0, 0, 1, 1], [], []>} : vector<16x64xbf16>, vector<64x32xbf16>, vector<16x32xf32> -> vector<16x32xf32>
    %308 = vector.broadcast %10 : vector<1x32xf32> to vector<16x32xf32>
    %309 = arith.addf %307, %308 : vector<16x32xf32>
    %310 = arith.addf %237, %309 : vector<16x32xf32>
    %c0_139 = arith.constant 0 : index
    %c0_140 = arith.constant 0 : index
    %311 = vector.load %arg10[%c0_139, %c0_140] : memref<16x32xf32, #tpu.memory_space<vmem>>, vector<16x32xf32>
    tpu.vector_store %arg10[%c0_139, %c0_140], %310 {strides = array<i32>} : memref<16x32xf32, #tpu.memory_space<vmem>>, vector<16x32xf32>,
    %c1_i32 = arith.constant 1 : i32
    %312 = arith.cmpi eq, %arg1, %c1_i32 : i32
    %313 = arith.extui %312 : i1 to i32
    %c0_i32_141 = arith.constant 0 : i32
    %314 = arith.cmpi ne, %313, %c0_i32_141 : i32
    scf.if %314 {
      %c0_142 = arith.constant 0 : index
      %c0_143 = arith.constant 0 : index
      %315 = vector.load %arg8[%c0_142, %c0_143] : memref<2x32xf32, #tpu.memory_space<vmem>>, vector<1x32xf32>
      %c1_144 = arith.constant 1 : index
      %c0_145 = arith.constant 0 : index
      %316 = vector.load %arg8[%c1_144, %c0_145] : memref<2x32xf32, #tpu.memory_space<vmem>>, vector<1x32xf32>
      %cst_146 = arith.constant dense<0.000000e+00> : vector<16xf32>
      %317 = vector.multi_reduction <add>, %310, %cst_146 [1] : vector<16x32xf32> to vector<16xf32>
      %318 = vector.shape_cast %317 : vector<16xf32> to vector<16x1xf32>
      %cst_147 = arith.constant 3.200000e+01 : f32
      %319 = vector.broadcast %cst_147 : f32 to vector<16x1xf32>
      %320 = arith.divf %318, %319 : vector<16x1xf32>
      %321 = vector.broadcast %320 : vector<16x1xf32> to vector<16x32xf32>
      %322 = arith.subf %310, %321 : vector<16x32xf32>
      %323 = arith.mulf %322, %322 : vector<16x32xf32>
      %cst_148 = arith.constant dense<0.000000e+00> : vector<16xf32>
      %324 = vector.multi_reduction <add>, %323, %cst_148 [1] : vector<16x32xf32> to vector<16xf32>
      %325 = vector.shape_cast %324 : vector<16xf32> to vector<16x1xf32>
      %cst_149 = arith.constant 3.200000e+01 : f32
      %326 = vector.broadcast %cst_149 : f32 to vector<16x1xf32>
      %327 = arith.divf %325, %326 : vector<16x1xf32>
      %cst_150 = arith.constant 9.99999974E-6 : f32
      %328 = vector.broadcast %cst_150 : f32 to vector<16x1xf32>
      %329 = arith.addf %327, %328 : vector<16x1xf32>
      %330 = math.rsqrt %329 : vector<16x1xf32>
      %331 = vector.broadcast %330 : vector<16x1xf32> to vector<16x32xf32>
      %332 = arith.mulf %322, %331 : vector<16x32xf32>
      %333 = vector.broadcast %315 : vector<1x32xf32> to vector<16x32xf32>
      %334 = arith.mulf %332, %333 : vector<16x32xf32>
      %335 = vector.broadcast %316 : vector<1x32xf32> to vector<16x32xf32>
      %336 = arith.addf %334, %335 : vector<16x32xf32>
      %c0_151 = arith.constant 0 : index
      %c0_152 = arith.constant 0 : index
      %c0_153 = arith.constant 0 : index
      %337 = vector.load %arg9[%c0_151, %c0_152, %c0_153] : memref<1x16x32xf32, #tpu.memory_space<vmem>>, vector<1x16x32xf32>
      %338 = vector.shape_cast %337 : vector<1x16x32xf32> to vector<16x32xf32>
      %339 = vector.shape_cast %336 : vector<16x32xf32> to vector<1x16x32xf32>
      tpu.vector_store %arg9[%c0_151, %c0_152, %c0_153], %339 {strides = array<i32>} : memref<1x16x32xf32, #tpu.memory_space<vmem>>, vector<1x16x32xf32>,
    } else {
    }
    return
  }
  func.func @transform_0(%arg0: i32, %arg1: i32) -> (i32, i32, i32) {
    %c0_i32 = arith.constant 0 : i32
    %c0_i32_0 = arith.constant 0 : i32
    %c0_i32_1 = arith.constant 0 : i32
    return %arg0, %c0_i32, %c0_i32_0 : i32, i32, i32
  }
  func.func @transform_1(%arg0: i32, %arg1: i32) -> (i32, i32, i32) {
    %c0_i32 = arith.constant 0 : i32
    %c0_i32_0 = arith.constant 0 : i32
    %c0_i32_1 = arith.constant 0 : i32
    return %arg1, %c0_i32, %c0_i32_0 : i32, i32, i32
  }
  func.func @transform_2(%arg0: i32, %arg1: i32) -> (i32, i32, i32, i32) {
    %c0_i32 = arith.constant 0 : i32
    %c0_i32_0 = arith.constant 0 : i32
    %c0_i32_1 = arith.constant 0 : i32
    %c0_i32_2 = arith.constant 0 : i32
    return %arg1, %c0_i32, %c0_i32_0, %c0_i32_1 : i32, i32, i32, i32
  }
  func.func @transform_3(%arg0: i32, %arg1: i32) -> (i32, i32, i32, i32) {
    %c0_i32 = arith.constant 0 : i32
    %c0_i32_0 = arith.constant 0 : i32
    %c0_i32_1 = arith.constant 0 : i32
    %c0_i32_2 = arith.constant 0 : i32
    return %arg1, %c0_i32, %c0_i32_0, %c0_i32_1 : i32, i32, i32, i32
  }
  func.func @transform_4(%arg0: i32, %arg1: i32) -> (i32, i32, i32) {
    %c0_i32 = arith.constant 0 : i32
    %c0_i32_0 = arith.constant 0 : i32
    %c0_i32_1 = arith.constant 0 : i32
    return %arg1, %c0_i32, %c0_i32_0 : i32, i32, i32
  }
  func.func @transform_5(%arg0: i32, %arg1: i32) -> (i32, i32, i32) {
    %c0_i32 = arith.constant 0 : i32
    %c0_i32_0 = arith.constant 0 : i32
    %c0_i32_1 = arith.constant 0 : i32
    return %arg1, %c0_i32, %c0_i32_0 : i32, i32, i32
  }
  func.func @transform_6(%arg0: i32, %arg1: i32) -> (i32, i32) {
    %c0_i32 = arith.constant 0 : i32
    %c0_i32_0 = arith.constant 0 : i32
    %c0_i32_1 = arith.constant 0 : i32
    return %c0_i32, %c0_i32_0 : i32, i32
  }
  func.func @transform_7(%arg0: i32, %arg1: i32) -> (i32, i32, i32) {
    %c0_i32 = arith.constant 0 : i32
    %c0_i32_0 = arith.constant 0 : i32
    %c0_i32_1 = arith.constant 0 : i32
    return %arg0, %c0_i32, %c0_i32_0 : i32, i32, i32
  }
}

</mosaic_0001>

<bundles_post_ra>
// kernel: tpu_custom_call.1
= control target key start
LH: loop header
LB: loop body
LE: loop exit
PB: predicated region body
PF: predicated region fallthrough
CT: control target
= control target key end

     0   :  { %12 = vsyncpa [#allocation4], 0  ;;  %s3941_s0 = inlined_call_operand.vmem [shape: f32[2,16,32], index: 0, kind: input, shape index: {}]   ;;  %s3942_s1 = inlined_call_operand.vmem [shape: f32[2,8,64], index: 1, kind: input, shape index: {}]   ;;  %s3943_s2 = inlined_call_operand.vmem [shape: bf16[2,12,32,16], index: 2, kind: input, shape index: {}]   ;;  %s3944_s3 = inlined_call_operand.vmem [shape: bf16[2,4,16,32], index: 3, kind: input, shape index: {}]   ;;  %s3945_s4 = inlined_call_operand.vmem [shape: bf16[2,32,64], index: 4, kind: input, shape index: {}]   ;;  %s3946_s5 = inlined_call_operand.vmem [shape: bf16[2,64,32], index: 5, kind: input, shape index: {}]   ;;  %s3947_s6 = inlined_call_operand.vmem [shape: f32[2,32], index: 6, kind: input, shape index: {}]   ;;  %s3948_s7 = inlined_call_operand.hbm [shape: f32[2,16,32], index: 7, kind: output, shape index: {}]  }
   0x1   :  { %14 = vsyncpa [#allocation4 + $0x1], 0  ;;  %s3446_s24 = smov 0   ;;  %s3448_s25 = smov 0  }
   0x2   :  { %s3450_s26 = smov 0   ;;  %s3452_s27 = smov 0  }
   0x3   :  { %s3454_s28 = smov 0   ;;  %s3456_s29 = smov 0  }
   0x4   :  { %s3458_s30 = smov 0   ;;  %s3460_s8 = smov 0  }
   0x5 LB: > { %3958 = sst [smem:[#allocation6_spill]] %s3371_s24  ;;  %s2672_s9 = sadd.s32 4294967295, %s3399_s8   ;;  %s3399_s8 = sphi %s3460_s8, %s20_s8   ;;  %s3395_s30 = sphi %s3458_s30, %s3978_s30   ;;  %s3391_s29 = sphi %s3456_s29, %s3977_s29   ;;  %s3387_s28 = sphi %s3454_s28, %s3976_s28   ;;  %s3383_s27 = sphi %s3452_s27, %s3975_s27   ;;  %s3379_s26 = sphi %s3450_s26, %s3974_s26   ;;  %s3375_s25 = sphi %s3448_s25, %s3980_s25   ;;  %s3371_s24 = sphi %s3446_s24, %s3979_s24  }
   0x6   : > { %3959 = sst [smem:[#allocation7_spill]] %s3379_s26  ;;  %s2673_s10 = sadd.s32 4294967294, %s3399_s8  }
   0x7   : > { %3960 = sst [smem:[#allocation8_spill]] %s3391_s29  ;;  %s29_s11 = sadd.s32 1, %s3391_s29 }
   0x8   : > { %3961 = sst [smem:[#allocation9_spill]] %s3395_s30  ;;  %p30_p0 = scmp.ge.s32.totalorder %s29_s11, 2 }
   0x9   : > { %3962 = sst [smem:[#allocation10_spill]] %s3399_s8  ;;  %s32_s12 = sadd.s32 1, %s3395_s30 }
   0xa   : > { %p226_p1 = scmp.ne.s32.totalorder %s3379_s26, %s3375_s25  ;;  %p227_p2 = scmp.eq.s32.totalorder %s2672_s9, 3 }
   0xb   : > { %s3982_s11 = smov (%p30_p0, %s29_s11), 0  ;;  %s3984_s12 = smov (!%p30_p0, %s32_s12), %s3395_s30 }
   0xc   : > { %3963 = sst [smem:[#allocation11_spill]] %s3982_s11  ;;  %p3495_p3 = por %p227_p2, %p226_p1 }
   0xd   : > { %p232_p4 = scmp.ne.s32.totalorder %s3375_s25, %s3371_s24  ;;  %p34_p5 = scmp.ge.s32.totalorder %s3984_s12, 2 }
   0xe   : > { %p233_p6 = scmp.eq.s32.totalorder %s2673_s10, 3  ;;  %p2676_p7 = scmp.ge.s32.totalorder %s3399_s8, 1 }
   0xf   : > { %p301_p8 = scmp.lt.s32.totalorder %s3399_s8, 5  ;;  %s3986_s12 = smov (%p34_p5, %s3984_s12), 0 }
  0x10   : > { %3965 = sst [smem:[#allocation12_spill]] %s3986_s12  ;;  %p3505_p9 = por %p233_p6, %p232_p4 }
  0x11   : > { %p302_p10 = pnand %p2676_p7, %p301_p8  ;;  %s213_s15 = ssub.s32 %s3395_s30, %s3986_s12 }
  0x12   : > { %s3966_s14 = scalar_select %p3505_p9, 1, 0 }
  0x13   : > { %s216_s16 = sadd.s32 1, %s3379_s26  ;;  %p214_p11 = scmp.eq.s32.totalorder %s213_s15, 0 }
  0x14   : > { %3967 = sst [smem:[#allocation13_spill]] %s3966_s14  ;;  %305 = sbr.rel (%p302_p10) target bundleno = 5418 (0x152a), region = 48 }
  0x15   : > { %s3513_s17 = scalar_select %p214_p11, %s3379_s26, %s216_s16  }
  0x16   : > { %s3954_s18 = sand.u32 (!%p302_p10), 1, %s3375_s25   ;;  %p357_p12 = scmp.lt.s32.totalorder (!%p302_p10), %s3387_s28, 1 }
  0x17   : > { %3968 = sst [smem:[#allocation14_spill]] %s3513_s17  ;;  %s2677_s19 = sshll.u32 (!%p302_p10), %s3954_s18, 4 }
  0x18   : > { %p362_p13 = scmp.lt.s32.totalorder (!%p302_p10), %s3383_s27, 1  ;;  %p2688_p0 = scmp.ne.s32.totalorder (!%p302_p10), %s3383_s27, 0 }
  0x1b   : > { %s358_s20 = scalar_select %p357_p12, %s3387_s28, 1 }
  0x1c   : > { %s363_s21 = scalar_select %p362_p13, %s3383_s27, 1 }
  0x1d   : > { %s2815_s22 = sshll.u32 %s358_s20, 4  ;;  %390 = sbr.rel (%p2688_p0) target bundleno = 36 (0x24), region = 52  ;;  %vm393_vm0 = vcmask (!%p2688_p0), 261120  }
  0x1e   : > { %s361_s10 = scalar_lea.vmem %s3941_s0, %s2815_s22  ;;  %s2680_s15 = sshll.u32 %s363_s21, 3 }
  0x1f   : > { %s3528_s11 = scalar_lea.vmem %s3942_s1, %s2680_s15  ;;  %s3140_s30 = smul.u32 192, %s363_s21  ;;  %v391_v0 = vld [vmem:[%s361_s10] sm:$0xff] (!%p2688_p0)  ;;  %v392_v1 = vld [vmem:[%s361_s10 + $0x8] sm:$0xff] (!%p2688_p0) }
  0x20   : > { %s2816_s29 = sshll.u32 %s363_s21, 5  ;;  %s2817_s17 = sshll.u32 %s363_s21, 4  ;;  %394 = vst.msk [vmem:[#allocation2] sm:$0xff] (!%p2688_p0), %vm393_vm0, %v391_v0  ;;  %395 = vst.msk [vmem:[#allocation2 + $0x8] sm:$0xff] (!%p2688_p0), %vm393_vm0, %v392_v1 }
  0x21   : > { %s3533_s18 = scalar_lea.vmem %s3943_s2, %s3140_s30  ;;  %s3538_s8 = scalar_lea.vmem %s3944_s3, %s2816_s29 }
  0x22   : > { %s3543_s9 = scalar_lea.vmem %s3945_s4, %s2817_s17  ;;  %s3548_s16 = scalar_lea.vmem %s3946_s5, %s2816_s29 }
  0x23   : > { %s3550_s21 = scalar_lea.vmem [#allocation3], %s2677_s19 }
  0x24 PF: > { %vm399_vm1 = vcmask 261120   ;;  %v3216_v16 = vld [vmem:[%s3533_s18] sm:$0xff]   ;;  %v3401_v18 = vmov 0.0   ;;  %v3218_v19 = vld [vmem:[%s3533_s18 + $0x8] sm:$0xff]   ;;  %vm3402_vm2 = vmmov 0   ;;  %v427_v24 = vlaneseq  ;;  %v3222_v0 = vld [vmem:[%s3533_s18 + $0x10] sm:$0xff]  }
  0x25   : > { %v3217_v17 = vld [vmem:[%s3533_s18 + $0x40] sm:$0xff]   ;;  %2904 = vmatprep.subr.bf16.mxu0 %v3401_v18  ;;  %2912 = vmatprep.subr.bf16.mxu1 %v3401_v18  ;;  %v3219_v20 = vld [vmem:[%s3533_s18 + $0x48] sm:$0xff]   ;;  %vm619_vm3 = vcmask 130048   ;;  %vm682_vm4 = vcmask 1043456   ;;  %vm666_vm5 = vcmask 64512   ;;  %vm2430_vm8 = vcmask 523264  }
  0x26   : > { %2905 = vmatpush3.bf16.msra.mxu0 %v3216_v16  ;;  %2913 = vmatpush3.bf16.msra.mxu1 %v3217_v17  ;;  %v3571_v28 = vshrl.u32 %v427_v24, 7  ;;  %v3575_v30 = vld [vmem:[%s3528_s11] sm:$0xff]  ;;  %v3221_v44 = vld [vmem:[%s3533_s18 + $0x88] sm:$0xff]   ;;  %p2807_p1 = scmp.ne.s32.totalorder %s3383_s27, 1 }
  0x27   : > { %v397_v2 = vld [vmem:[#allocation2] sm:$0xff]  ;;  %v398_v3 = vld [vmem:[#allocation2 + $0x8] sm:$0xff]  ;;  %2906 = vmatprep.subr.bf16.mxu0 %v3401_v18  ;;  %2914 = vmatprep.subr.bf16.mxu1 %v3401_v18 }
  0x28   : > { %v400_v4 = vsel %vm399_vm1, %v397_v2, 0.0  ;;  %v403_v5 = vsel %vm399_vm1, %v398_v3, 0.0  ;;  %2908 = vmatprep.mubr.msk.bf16.mxu0 %vm3402_vm2, %v3401_v18  ;;  %2916 = vmatprep.mubr.msk.bf16.mxu1 %vm3402_vm2, %v3401_v18  ;;  %v429_v29 = vsub.s32 0, %v3571_v28  ;;  %v435_v32 = vsub.s32 1, %v3571_v28  ;;  %v3220_v42 = vld [vmem:[%s3533_s18 + $0x80] sm:$0xff]  }
  0x29   : > { %401 = vadd.xlane.f32.xlu0 %v400_v4  ;;  %v3225_v4 = vld [vmem:[%s3533_s18 + $0x98] sm:$0xff]  }
  0x2a   : > { %2907 = vmatpush3.bf16.msra.mxu0 %v3218_v19  ;;  %2915 = vmatpush3.bf16.msra.mxu1 %v3219_v20  ;;  %v430_v34 = vrot.slane %v3575_v30, %v429_v29  ;;  %v436_v37 = vrot.slane %v3575_v30, %v435_v32 }
  0x2b   : > { %2920 = vmatprep.subr.bf16.mxu0 %v3401_v18  ;;  %2928 = vmatprep.subr.bf16.mxu1 %v3401_v18 }
  0x2d   : > { %404 = vadd.xlane.f32.xlu0 %v403_v5 }
  0xb6   : > { %v402_v6 = vpop.xlane.xlu0 %401 }
  0xb7   : > { %v407_v7 = vmul.f32 0.03125, %v402_v6 }
  0xb9   : > { %v409_v8 = vsub.f32 %v397_v2, %v407_v7  ;;  %v3223_v2 = vld [vmem:[%s3533_s18 + $0x18] sm:$0xff]  }
  0xba   : > { %v405_v9 = vpop.xlane.xlu0 %404 }
  0xbb   : > { %v408_v10 = vmul.f32 0.03125, %v405_v9  ;;  %v411_v11 = vmul.f32 %v409_v8, %v409_v8 }
  0xbd   : > { %v410_v12 = vsub.f32 %v398_v3, %v408_v10  ;;  %v413_v13 = vsel %vm399_vm1, %v411_v11, 0.0  ;;  %v3224_v3 = vld [vmem:[%s3533_s18 + $0x90] sm:$0xff]  }
  0xbe   : > { %414 = vadd.xlane.f32.xlu1 %v413_v13 }
  0xbf   : > { %v412_v14 = vmul.f32 %v410_v12, %v410_v12 }
  0xc1   : > { %v416_v15 = vsel %vm399_vm1, %v412_v14, 0.0 }
  0xc2   : > { %417 = vadd.xlane.f32.xlu1 %v416_v15 }
 0x14b   : > { %v415_v21 = vpop.xlane.xlu1 %414 }
 0x14c   : > { %v419_v22 = vmul.f32 0.03125, %v415_v21 }
 0x14e   : > { %v421_v23 = vadd.f32 1e-05, %v419_v22 }
 0x14f   : > { %v418_v25 = vpop.xlane.xlu1 %417 }
 0x150   : > { %3250 = vrsqrt.f32 %v421_v23  ;;  %v420_v26 = vmul.f32 0.03125, %v418_v25 }
 0x152   : > { %v422_v27 = vadd.f32 1e-05, %v420_v26 }
 0x154   : > { %3252 = vrsqrt.f32 %v422_v27 }
 0x15a   : > { %v3251_v31 = vpop.eup %3250 }
 0x15b   : > { %v425_v33 = vmul.f32 %v3251_v31, %v409_v8 }
 0x15d   : > { %v431_v36 = vmul.f32 %v430_v34, %v425_v33 }
 0x15e   : > { %v3253_v35 = vpop.eup %3252 }
 0x15f   : > { %v426_v38 = vmul.f32 %v3253_v35, %v410_v12  ;;  %v437_v40 = vadd.f32 %v436_v37, %v431_v36 }
 0x161   : > { %v432_v39 = vmul.f32 %v430_v34, %v426_v38 }
 0x163   : > { %v438_v41 = vadd.f32 %v436_v37, %v432_v39 }
 0x165   : > { %v3581_v43 = vpack.c.bf16 %v438_v41, %v437_v40 }
 0x167   : > { %2909 = vmatmul.mubr.msk.bf16.vlgmr.msra.gmra.mrb[0].mxu0 %vm399_vm1, %v3581_v43  ;;  %2917 = vmatmul.mubr.msk.bf16.vlgmr.msra.gmra.mrb[0].mxu1 %vm399_vm1, %v3581_v43 }
 0x168   : > { %2921 = vmatpush3.bf16.msra.mxu0 %v3220_v42  ;;  %2924 = vmatprep.mubr.msk.bf16.mxu0 %vm3402_vm2, %v3401_v18 }
 0x169   : > { %2922 = vmatprep.subr.bf16.mxu0 %v3401_v18  ;;  %2930 = vmatprep.mubr.msk.bf16.mxu1 %vm3402_vm2, %v3401_v18 }
 0x16c   : > { %2923 = vmatpush3.bf16.msra.mxu0 %v3221_v44 }
 0x16d   : > { %2934 = vmatprep.subr.bf16.mxu0 %v3401_v18 }
 0x16f   : > { %2925 = vmatmul.mubr.msk.bf16.vlgmr.msra.gmra.mrb[4].mxu0 %vm399_vm1, %v3581_v43 }
 0x170   : > { %2936 = vmatprep.mubr.msk.bf16.mxu0 %vm3402_vm2, %v3401_v18 }
 0x23a   : > { %v493_v45 = vpop.f32.mrb[0].mxu0  ;;  %v552_v46 = vpop.f32.mrb[0].mxu1 }
 0x23b   : > { %v2910_v47 = vpop.f32.mrb[1].mxu0  ;;  %v2918_v48 = vpop.f32.mrb[1].mxu1 }
 0x23c   : > { %v496_v49 = vpop.f32.mrb[2].mxu0  ;;  %v555_v50 = vpop.f32.mrb[2].mxu1 }
 0x23d   : > { %v500_v51 = vpack.c.bf16 %v496_v49, %v493_v45  ;;  %v559_v52 = vpack.c.bf16 %v555_v50, %v552_v46  ;;  %v2911_v53 = vpop.f32.mrb[3].mxu0  ;;  %v2919_v54 = vpop.f32.mrb[3].mxu1  ;;  %v3226_v49 = vld [vmem:[%s3533_s18 + $0x50] sm:$0xff]  }
 0x23f   : > { %v624_v55 = vsel %vm619_vm3, %v559_v52, 0  ;;  %v729_v57 = vrot.slane %v559_v52, 4  ;;  %v727_v1 = vrot.slane %v500_v51, 4 }
 0x240   : > { %2929 = vmatpush3.bf16.xpose.msra.mxu1 %v624_v55 }
 0x241   : > { %2940 = vmatprep.subr.bf16.mxu1 %v3401_v18  ;;  %v734_v63 = vsel %vm619_vm3, %v729_v57, 0 }
 0x242   : > { %v611_v56 = vpop.f32.mrb[4].mxu0 }
 0x243   : > { %v2926_v58 = vpop.f32.mrb[5].mxu0 }
 0x244   : > { %v614_v59 = vpop.f32.mrb[6].mxu0 }
 0x245   : > { %v3600_v60 = vpack.c.bf16 %v614_v59, %v611_v56  ;;  %v2927_v61 = vpop.f32.mrb[7].mxu0 }
 0x247   : > { %v684_v62 = vsel %vm682_vm4, %v3600_v60, 0  ;;  %2931 = vmatmul.mubr.msk.bf16.vlgmr.msra.gmra.mrb[4].mxu1 %vm619_vm3, %v500_v51  ;;  %v789_v42 = vrot.slane %v3600_v60, 4  ;;  %v3227_v51 = vld [vmem:[%s3533_s18 + $0x58] sm:$0xff]  }
 0x248   : > { %2935 = vmatpush3.bf16.msra.mxu0 %v684_v62  ;;  %2941 = vmatpush3.bf16.xpose.msra.mxu1 %v734_v63 }
 0x249   : > { %2942 = vmatprep.mubr.msk.bf16.mxu1 %vm3402_vm2, %v3401_v18  ;;  %2952 = vmatprep.subr.bf16.mxu1 %v3401_v18  ;;  %v794_v46 = vsel %vm682_vm4, %v789_v42, 0  ;;  %v3231_v42 = vld [vmem:[%s3538_s8 + $0x8] sm:$0xff]  }
 0x24a   : > { %2946 = vmatprep.subr.bf16.mxu0 %v3401_v18 }
 0x24f   : > { %2943 = vmatmul.mubr.msk.bf16.vlgmr.msra.gmra.mrb[8].mxu1 %vm619_vm3, %v727_v1 }
 0x250   : > { %2953 = vmatpush3.bf16.msra.mxu1 %v3222_v0  ;;  %2956 = vmatprep.mubr.msk.bf16.mxu1 %vm3402_vm2, %v3401_v18 }
 0x251   : > { %2954 = vmatprep.subr.bf16.mxu1 %v3401_v18 }
 0x254   : > { %2955 = vmatpush3.bf16.msra.mxu1 %v3223_v2 }
 0x255   : > { %2968 = vmatprep.subr.bf16.mxu1 %v3401_v18 }
 0x257   : > { %2957 = vmatmul.mubr.msk.bf16.vlgmr.msra.gmra.mrb[12].mxu1 %vm399_vm1, %v3581_v43 }
 0x258   : > { %2969 = vmatpush3.bf16.msra.mxu1 %v3224_v3  ;;  %2972 = vmatprep.mubr.msk.bf16.mxu1 %vm3402_vm2, %v3401_v18 }
 0x259   : > { %2970 = vmatprep.subr.bf16.mxu1 %v3401_v18 }
 0x25c   : > { %2971 = vmatpush3.bf16.msra.mxu1 %v3225_v4 }
 0x25d   : > { %2982 = vmatprep.subr.bf16.mxu1 %v3401_v18 }
 0x25f   : > { %2973 = vmatmul.mubr.msk.bf16.vlgmr.msra.gmra.mrb[16].mxu1 %vm399_vm1, %v3581_v43 }
 0x260   : > { %2984 = vmatprep.mubr.msk.bf16.mxu1 %vm3402_vm2, %v3401_v18 }
 0x31a   : > { %v660_v5 = vpop.f32.mrb[4].mxu1 }
 0x31b   : > { %v2932_v6 = vpop.f32.mrb[5].mxu1  ;;  %v667_v7 = vsel %vm666_vm5, %v660_v5, -inf }
 0x31c   : > { %668 = vmax.xlane.f32.xlu0 %v667_v7  ;;  %v663_v8 = vpop.f32.mrb[6].mxu1 }
 0x31d   : > { %v2933_v9 = vpop.f32.mrb[7].mxu1 }
 0x322   : > { %v770_v10 = vpop.f32.mrb[8].mxu1 }
 0x323   : > { %v2944_v11 = vpop.f32.mrb[9].mxu1  ;;  %v776_v12 = vsel %vm666_vm5, %v770_v10, -inf }
 0x324   : > { %777 = vmax.xlane.f32.xlu1 %v776_v12  ;;  %v773_v13 = vpop.f32.mrb[10].mxu1 }
 0x325   : > { %v2945_v14 = vpop.f32.mrb[11].mxu1 }
 0x32a   : > { %v890_v15 = vpop.f32.mrb[12].mxu1 }
 0x32b   : > { %v2958_v16 = vpop.f32.mrb[13].mxu1 }
 0x32c   : > { %v893_v17 = vpop.f32.mrb[14].mxu1 }
 0x32d   : > { %v3631_v19 = vpack.c.bf16 %v893_v17, %v890_v15  ;;  %v2959_v20 = vpop.f32.mrb[15].mxu1 }
 0x332   : > { %v1008_v21 = vpop.f32.mrb[16].mxu1 }
 0x333   : > { %v2974_v22 = vpop.f32.mrb[17].mxu1 }
 0x334   : > { %v1011_v23 = vpop.f32.mrb[18].mxu1 }
 0x335   : > { %v3633_v24 = vpack.c.bf16 %v1011_v23, %v1008_v21  ;;  %v2975_v25 = vpop.f32.mrb[19].mxu1 }
 0x337   : > { %v1078_v26 = vsel %vm682_vm4, %v3633_v24, 0 }
 0x338   : > { %2983 = vmatpush3.bf16.msra.mxu1 %v1078_v26 }
 0x339   : > { %2994 = vmatprep.subr.bf16.mxu1 %v3401_v18 }
 0x3a9   : > { %v669_v27 = vpop.xlane.xlu0 %668 }
 0x3aa   : > { %v670_v29 = vsub.f32 %v660_v5, %v669_v27  ;;  %v1121_v5 = vrot.slane %v3631_v19, 4 }
 0x3ac   : > { %v671_v31 = vmul.f32 1.442695, %v670_v29 }
 0x3ae   : > { %3254 = vpow2.f32 %v671_v31 }
 0x3b1   : > { %v778_v32 = vpop.xlane.xlu1 %777 }
 0x3b2   : > { %v779_v33 = vsub.f32 %v770_v10, %v778_v32 }
 0x3b4   : > { %v780_v34 = vmul.f32 1.442695, %v779_v33  ;;  %v1183_v33 = vrot.slane %v3633_v24, 4  ;;  %v3229_v24 = vld [vmem:[%s3533_s18 + $0x60] sm:$0xff]  }
 0x3b6   : > { %3256 = vpow2.f32 %v780_v34 }
 0x3b8   : > { %v3255_v35 = vpop.eup %3254 }
 0x3b9   : > { %v673_v36 = vsel %vm666_vm5, %v3255_v35, 0.0 }
 0x3ba   : > { %674 = vadd.xlane.f32.xlu0 %v673_v36  ;;  %v1188_v36 = vsel %vm682_vm4, %v1183_v33, 0 }
 0x3c0   : > { %v3257_v37 = vpop.eup %3256 }
 0x3c1   : > { %v782_v38 = vsel %vm666_vm5, %v3257_v37, 0.0 }
 0x3c2   : > { %783 = vadd.xlane.f32.xlu1 %v782_v38 }
 0x447   : > { %v675_v39 = vpop.xlane.xlu0 %674 }
 0x448   : > { %3258 = vrcp.f32 %v675_v39  ;;  %v3228_v39 = vld [vmem:[%s3538_s8] sm:$0xff]  }
 0x44f   : > { %v784_v40 = vpop.xlane.xlu1 %783 }
 0x450   : > { %3260 = vrcp.f32 %v784_v40 }
 0x452   : > { %v3259_v41 = vpop.eup %3258 }
 0x453   : > { %v677_v44 = vmul.f32 %v3259_v41, %v3255_v35  ;;  %v3230_v41 = vld [vmem:[%s3533_s18 + $0x68] sm:$0xff]  }
 0x455   : > { %v678_v45 = vpack.c.bf16 %v677_v44, %v677_v44 }
 0x457   : > { %2937 = vmatmul.mubr.msk.bf16.vlgmr.msra.gmra.mrb[8].mxu0 %vm666_vm5, %v678_v45 }
 0x458   : > { %2947 = vmatpush3.bf16.msra.mxu0 %v794_v46  ;;  %2948 = vmatprep.mubr.msk.bf16.mxu0 %vm3402_vm2, %v3401_v18 }
 0x459   : > { %2960 = vmatprep.subr.bf16.mxu0 %v3401_v18 }
 0x45a   : > { %v3261_v47 = vpop.eup %3260 }
 0x45b   : > { %v786_v48 = vmul.f32 %v3261_v47, %v3257_v37 }
 0x45d   : > { %v787_v50 = vpack.c.bf16 %v786_v48, %v786_v48 }
 0x45f   : > { %2949 = vmatmul.mubr.msk.bf16.vlgmr.msra.gmra.mrb[12].mxu0 %vm666_vm5, %v787_v50 }
 0x460   : > { %2961 = vmatpush3.bf16.msra.mxu0 %v3226_v49  ;;  %2964 = vmatprep.mubr.msk.bf16.mxu0 %vm3402_vm2, %v3401_v18  ;;  %v3232_v49 = vld [vmem:[%s3533_s18 + $0x20] sm:$0xff]  }
 0x461   : > { %2962 = vmatprep.subr.bf16.mxu0 %v3401_v18 }
 0x464   : > { %2963 = vmatpush3.bf16.msra.mxu0 %v3227_v51 }
 0x465   : > { %2976 = vmatprep.subr.bf16.mxu0 %v3401_v18 }
 0x467   : > { %2965 = vmatmul.mubr.msk.bf16.vlgmr.msra.gmra.mrb[16].mxu0 %vm399_vm1, %v3581_v43 }
 0x468   : > { %2978 = vmatprep.mubr.msk.bf16.mxu0 %vm3402_vm2, %v3401_v18 }
 0x52a   : > { %v3657_v52 = vpop.f32.mrb[8].mxu0 }
 0x52b   : > { %v2938_v53 = vpop.f32.mrb[9].mxu0 }
 0x52c   : > { %v723_v54 = vpop.f32.mrb[10].mxu0 }
 0x52d   : > { %v2939_v55 = vpop.f32.mrb[11].mxu0  ;;  %v3233_v54 = vld [vmem:[%s3533_s18 + $0x28] sm:$0xff]  }
 0x532   : > { %v3659_v56 = vpop.f32.mrb[12].mxu0 }
 0x533   : > { %v836_v57 = vpack.c.bf16 %v3659_v56, %v3657_v52  ;;  %v2950_v58 = vpop.f32.mrb[13].mxu0  ;;  %v3234_v56 = vld [vmem:[%s3533_s18 + $0xa0] sm:$0xff]  }
 0x534   : > { %v833_v59 = vpop.f32.mrb[14].mxu0 }
 0x535   : > { %v2951_v60 = vpop.f32.mrb[15].mxu0 }
 0x536   : > { %v3235_v60 = vld [vmem:[%s3533_s18 + $0xa8] sm:$0xff]  }
 0x53a   : > { %v949_v61 = vpop.f32.mrb[16].mxu0 }
 0x53b   : > { %v2966_v62 = vpop.f32.mrb[17].mxu0 }
 0x53c   : > { %v952_v63 = vpop.f32.mrb[18].mxu0 }
 0x53d   : > { %v956_v0 = vpack.c.bf16 %v952_v63, %v949_v61  ;;  %v2967_v1 = vpop.f32.mrb[19].mxu0 }
 0x53f   : > { %v1020_v2 = vsel %vm619_vm3, %v956_v0, 0  ;;  %v1123_v3 = vrot.slane %v956_v0, 4 }
 0x540   : > { %2977 = vmatpush3.bf16.xpose.msra.mxu0 %v1020_v2 }
 0x541   : > { %2988 = vmatprep.subr.bf16.mxu0 %v3401_v18  ;;  %v1128_v4 = vsel %vm619_vm3, %v1123_v3, 0 }
 0x547   : > { %2979 = vmatmul.mubr.msk.bf16.vlgmr.msra.gmra.mrb[20].mxu0 %vm619_vm3, %v3631_v19 }
 0x548   : > { %2989 = vmatpush3.bf16.xpose.msra.mxu0 %v1128_v4  ;;  %2990 = vmatprep.mubr.msk.bf16.mxu0 %vm3402_vm2, %v3401_v18 }
 0x549   : > { %3000 = vmatprep.subr.bf16.mxu0 %v3401_v18 }
 0x54f   : > { %2991 = vmatmul.mubr.msk.bf16.vlgmr.msra.gmra.mrb[24].mxu0 %vm619_vm3, %v1121_v5 }
 0x550   : > { %3002 = vmatprep.mubr.msk.bf16.mxu0 %vm3402_vm2, %v3401_v18  ;;  %3001 = vmatpush3.bf16.msra.mxu0 %v3231_v42 }
 0x551   : > { %3012 = vmatprep.subr.bf16.mxu0 %v3401_v18 }
 0x61a   : > { %v1056_v6 = vpop.f32.mrb[20].mxu0 }
 0x61b   : > { %v2980_v7 = vpop.f32.mrb[21].mxu0  ;;  %v1062_v8 = vsel %vm666_vm5, %v1056_v6, -inf }
 0x61c   : > { %1063 = vmax.xlane.f32.xlu0 %v1062_v8  ;;  %v1059_v9 = vpop.f32.mrb[22].mxu0 }
 0x61d   : > { %v2981_v10 = vpop.f32.mrb[23].mxu0 }
 0x622   : > { %v1164_v11 = vpop.f32.mrb[24].mxu0 }
 0x623   : > { %v2992_v12 = vpop.f32.mrb[25].mxu0  ;;  %v1170_v13 = vsel %vm666_vm5, %v1164_v11, -inf }
 0x624   : > { %1171 = vmax.xlane.f32.xlu1 %v1170_v13  ;;  %v1167_v14 = vpop.f32.mrb[26].mxu0 }
 0x625   : > { %v2993_v15 = vpop.f32.mrb[27].mxu0 }
 0x6a9   : > { %v1064_v16 = vpop.xlane.xlu0 %1063 }
 0x6aa   : > { %v1065_v17 = vsub.f32 %v1056_v6, %v1064_v16 }
 0x6ac   : > { %v1066_v19 = vmul.f32 1.442695, %v1065_v17 }
 0x6ae   : > { %3262 = vpow2.f32 %v1066_v19 }
 0x6b1   : > { %v1172_v20 = vpop.xlane.xlu1 %1171 }
 0x6b2   : > { %v1173_v21 = vsub.f32 %v1164_v11, %v1172_v20 }
 0x6b4   : > { %v1174_v22 = vmul.f32 1.442695, %v1173_v21 }
 0x6b6   : > { %3264 = vpow2.f32 %v1174_v22 }
 0x6b8   : > { %v3263_v23 = vpop.eup %3262 }
 0x6b9   : > { %v1068_v25 = vsel %vm666_vm5, %v3263_v23, 0.0 }
 0x6ba   : > { %1069 = vadd.xlane.f32.xlu0 %v1068_v25 }
 0x6c0   : > { %v3265_v26 = vpop.eup %3264 }
 0x6c1   : > { %v1176_v27 = vsel %vm666_vm5, %v3265_v26, 0.0 }
 0x6c2   : > { %1177 = vadd.xlane.f32.xlu1 %v1176_v27 }
 0x747   : > { %v1070_v29 = vpop.xlane.xlu0 %1069 }
 0x748   : > { %3266 = vrcp.f32 %v1070_v29 }
 0x74f   : > { %v1178_v31 = vpop.xlane.xlu1 %1177 }
 0x750   : > { %3268 = vrcp.f32 %v1178_v31 }
 0x752   : > { %v3267_v32 = vpop.eup %3266 }
 0x753   : > { %v1072_v34 = vmul.f32 %v3267_v32, %v3263_v23 }
 0x755   : > { %v1073_v35 = vpack.c.bf16 %v1072_v34, %v1072_v34 }
 0x757   : > { %2985 = vmatmul.mubr.msk.bf16.vlgmr.msra.gmra.mrb[20].mxu1 %vm666_vm5, %v1073_v35 }
 0x758   : > { %2995 = vmatpush3.bf16.msra.mxu1 %v1188_v36  ;;  %2996 = vmatprep.mubr.msk.bf16.mxu1 %vm3402_vm2, %v3401_v18 }
 0x759   : > { %3006 = vmatprep.subr.bf16.mxu1 %v3401_v18 }
 0x75a   : > { %v3269_v37 = vpop.eup %3268 }
 0x75b   : > { %v1180_v38 = vmul.f32 %v3269_v37, %v3265_v26 }
 0x75d   : > { %v1181_v40 = vpack.c.bf16 %v1180_v38, %v1180_v38 }
 0x75f   : > { %2997 = vmatmul.mubr.msk.bf16.vlgmr.msra.gmra.mrb[24].mxu1 %vm666_vm5, %v1181_v40 }
 0x760   : > { %3007 = vmatpush3.bf16.msra.mxu1 %v3228_v39  ;;  %3008 = vmatprep.mubr.msk.bf16.mxu1 %vm3402_vm2, %v3401_v18 }
 0x761   : > { %3020 = vmatprep.subr.bf16.mxu1 %v3401_v18 }
 0x767   : > { %3009 = vmatmul.mubr.msk.bf16.vlgmr.msra.gmra.mrb[28].mxu1 %vm619_vm3, %v836_v57 }
 0x768   : > { %3021 = vmatpush3.bf16.msra.mxu1 %v3229_v24  ;;  %3024 = vmatprep.mubr.msk.bf16.mxu1 %vm3402_vm2, %v3401_v18 }
 0x769   : > { %3022 = vmatprep.subr.bf16.mxu1 %v3401_v18 }
 0x76c   : > { %3023 = vmatpush3.bf16.msra.mxu1 %v3230_v41 }
 0x76d   : > { %3036 = vmatprep.subr.bf16.mxu1 %v3401_v18 }
 0x76f   : > { %3025 = vmatmul.mubr.msk.bf16.vlgmr.msra.gmra.mrb[32].mxu1 %vm399_vm1, %v3581_v43 }
 0x770   : > { %3038 = vmatprep.mubr.msk.bf16.mxu1 %vm3402_vm2, %v3401_v18 }
 0x82a   : > { %v1114_v44 = vpop.f32.mrb[20].mxu1 }
 0x82b   : > { %v2986_v45 = vpop.f32.mrb[21].mxu1 }
 0x82c   : > { %v1117_v46 = vpop.f32.mrb[22].mxu1 }
 0x82d   : > { %v2987_v47 = vpop.f32.mrb[23].mxu1 }
 0x832   : > { %v1224_v48 = vpop.f32.mrb[24].mxu1 }
 0x833   : > { %v1230_v50 = vpack.c.bf16 %v1224_v48, %v1114_v44  ;;  %v2998_v51 = vpop.f32.mrb[25].mxu1 }
 0x834   : > { %v1227_v52 = vpop.f32.mrb[26].mxu1 }
 0x835   : > { %v2999_v53 = vpop.f32.mrb[27].mxu1  ;;  %3003 = vmatmul.mubr.msk.bf16.vlgmr.msra.gmra.mrb[28].mxu0 %vm619_vm3, %v1230_v50 }
 0x836   : > { %3013 = vmatpush3.bf16.msra.mxu0 %v3232_v49  ;;  %3016 = vmatprep.mubr.msk.bf16.mxu0 %vm3402_vm2, %v3401_v18 }
 0x837   : > { %3014 = vmatprep.subr.bf16.mxu0 %v3401_v18 }
 0x83a   : > { %v1327_v55 = vpop.f32.mrb[28].mxu1  ;;  %3015 = vmatpush3.bf16.msra.mxu0 %v3233_v54 }
 0x83b   : > { %v3010_v57 = vpop.f32.mrb[29].mxu1  ;;  %3028 = vmatprep.subr.bf16.mxu0 %v3401_v18 }
 0x83c   : > { %v1330_v58 = vpop.f32.mrb[30].mxu1 }
 0x83d   : > { %v3011_v59 = vpop.f32.mrb[31].mxu1  ;;  %3017 = vmatmul.mubr.msk.bf16.vlgmr.msra.gmra.mrb[32].mxu0 %vm399_vm1, %v3581_v43 }
 0x83e   : > { %3029 = vmatpush3.bf16.msra.mxu0 %v3234_v56  ;;  %3032 = vmatprep.mubr.msk.bf16.mxu0 %vm3402_vm2, %v3401_v18  ;;  %v3236_v56 = vld [vmem:[%s3533_s18 + $0x30] sm:$0xff]  }
 0x83f   : > { %3030 = vmatprep.subr.bf16.mxu0 %v3401_v18  ;;  %v3238_v59 = vld [vmem:[%s3533_s18 + $0xb0] sm:$0xff]  }
 0x842   : > { %v1444_v61 = vpop.f32.mrb[32].mxu1  ;;  %3031 = vmatpush3.bf16.msra.mxu0 %v3235_v60  ;;  %v3239_v60 = vld [vmem:[%s3533_s18 + $0xb8] sm:$0xff]  }
 0x843   : > { %v3026_v62 = vpop.f32.mrb[33].mxu1  ;;  %3042 = vmatprep.subr.bf16.mxu0 %v3401_v18 }
 0x844   : > { %v1447_v63 = vpop.f32.mrb[34].mxu1 }
 0x845   : > { %v1451_v0 = vpack.c.bf16 %v1447_v63, %v1444_v61  ;;  %v3027_v1 = vpop.f32.mrb[35].mxu1  ;;  %3033 = vmatmul.mubr.msk.bf16.vlgmr.msra.gmra.mrb[36].mxu0 %vm399_vm1, %v3581_v43  ;;  %v3240_v61 = vld [vmem:[%s3538_s8 + $0x10] sm:$0xff]  }
 0x846   : > { %3044 = vmatprep.mubr.msk.bf16.mxu0 %vm3402_vm2, %v3401_v18 }
 0x847   : > { %v1515_v2 = vsel %vm619_vm3, %v1451_v0, 0  ;;  %v1618_v10 = vrot.slane %v1451_v0, 4 }
 0x848   : > { %3037 = vmatpush3.bf16.xpose.msra.mxu1 %v1515_v2 }
 0x849   : > { %3048 = vmatprep.subr.bf16.mxu1 %v3401_v18  ;;  %v1623_v15 = vsel %vm619_vm3, %v1618_v10, 0  ;;  %v3242_v10 = vld [vmem:[%s3533_s18 + $0x78] sm:$0xff]  }
 0x908   : > { %v1277_v3 = vpop.f32.mrb[28].mxu0 }
 0x909   : > { %v3727_v4 = vadd.f32 %v1327_v55, %v1277_v3  ;;  %v3004_v5 = vpop.f32.mrb[29].mxu0  ;;  %v3241_v3 = vld [vmem:[%s3533_s18 + $0x70] sm:$0xff]  }
 0x90a   : > { %v1280_v6 = vpop.f32.mrb[30].mxu0 }
 0x90b   : > { %v3729_v7 = vadd.f32 %v1330_v58, %v1280_v6  ;;  %v3005_v8 = vpop.f32.mrb[31].mxu0  ;;  %v3237_v58 = vld [vmem:[%s3533_s18 + $0x38] sm:$0xff]  }
 0x910   : > { %v1385_v9 = vpop.f32.mrb[32].mxu0 }
 0x911   : > { %v3018_v11 = vpop.f32.mrb[33].mxu0 }
 0x912   : > { %v1388_v12 = vpop.f32.mrb[34].mxu0 }
 0x913   : > { %v1392_v13 = vpack.c.bf16 %v1388_v12, %v1385_v9  ;;  %v3019_v14 = vpop.f32.mrb[35].mxu0 }
 0x915   : > { %3039 = vmatmul.mubr.msk.bf16.vlgmr.msra.gmra.mrb[36].mxu1 %vm619_vm3, %v1392_v13  ;;  %v1616_v20 = vrot.slane %v1392_v13, 4 }
 0x916   : > { %3049 = vmatpush3.bf16.xpose.msra.mxu1 %v1623_v15  ;;  %3050 = vmatprep.mubr.msk.bf16.mxu1 %vm3402_vm2, %v3401_v18 }
 0x917   : > { %3060 = vmatprep.subr.bf16.mxu1 %v3401_v18 }
 0x918   : > { %v1503_v16 = vpop.f32.mrb[36].mxu0 }
 0x919   : > { %v3034_v17 = vpop.f32.mrb[37].mxu0 }
 0x91a   : > { %v1506_v19 = vpop.f32.mrb[38].mxu0 }
 0x91b   : > { %v1510_v21 = vpack.c.bf16 %v1506_v19, %v1503_v16  ;;  %v3035_v22 = vpop.f32.mrb[39].mxu0 }
 0x91d   : > { %v1573_v23 = vsel %vm682_vm4, %v1510_v21, 0  ;;  %3051 = vmatmul.mubr.msk.bf16.vlgmr.msra.gmra.mrb[40].mxu1 %vm619_vm3, %v1616_v20  ;;  %v1678_v50 = vrot.slane %v1510_v21, 4 }
 0x91e   : > { %3043 = vmatpush3.bf16.msra.mxu0 %v1573_v23  ;;  %3062 = vmatprep.mubr.msk.bf16.mxu1 %vm3402_vm2, %v3401_v18 }
 0x91f   : > { %3054 = vmatprep.subr.bf16.mxu0 %v3401_v18  ;;  %v1683_v53 = vsel %vm682_vm4, %v1678_v50, 0  ;;  %3061 = vmatpush3.bf16.msra.mxu1 %v3240_v61 }
 0x920   : > { %3074 = vmatprep.subr.bf16.mxu1 %v3401_v18 }
 0x9e8   : > { %v1551_v25 = vpop.f32.mrb[36].mxu1 }
 0x9e9   : > { %v3040_v26 = vpop.f32.mrb[37].mxu1  ;;  %v1557_v27 = vsel %vm666_vm5, %v1551_v25, -inf }
 0x9ea   : > { %1558 = vmax.xlane.f32.xlu0 %v1557_v27  ;;  %v1554_v29 = vpop.f32.mrb[38].mxu1 }
 0x9eb   : > { %v3041_v31 = vpop.f32.mrb[39].mxu1 }
 0x9f0   : > { %v1659_v32 = vpop.f32.mrb[40].mxu1 }
 0x9f1   : > { %v3052_v33 = vpop.f32.mrb[41].mxu1  ;;  %v1665_v34 = vsel %vm666_vm5, %v1659_v32, -inf }
 0x9f2   : > { %1666 = vmax.xlane.f32.xlu1 %v1665_v34  ;;  %v1662_v35 = vpop.f32.mrb[42].mxu1 }
 0x9f3   : > { %v3053_v36 = vpop.f32.mrb[43].mxu1 }
 0xa77   : > { %v1559_v37 = vpop.xlane.xlu0 %1558 }
 0xa78   : > { %v1560_v38 = vsub.f32 %v1551_v25, %v1559_v37 }
 0xa7a   : > { %v1561_v39 = vmul.f32 1.442695, %v1560_v38 }
 0xa7c   : > { %3270 = vpow2.f32 %v1561_v39 }
 0xa7f   : > { %v1667_v40 = vpop.xlane.xlu1 %1666 }
 0xa80   : > { %v1668_v24 = vsub.f32 %v1659_v32, %v1667_v40 }
 0xa82   : > { %v1669_v41 = vmul.f32 1.442695, %v1668_v24 }
 0xa84   : > { %3272 = vpow2.f32 %v1669_v41 }
 0xa86   : > { %v3271_v42 = vpop.eup %3270 }
 0xa87   : > { %v1563_v44 = vsel %vm666_vm5, %v3271_v42, 0.0 }
 0xa88   : > { %1564 = vadd.xlane.f32.xlu0 %v1563_v44 }
 0xa8e   : > { %v3273_v45 = vpop.eup %3272 }
 0xa8f   : > { %v1671_v46 = vsel %vm666_vm5, %v3273_v45, 0.0 }
 0xa90   : > { %1672 = vadd.xlane.f32.xlu1 %v1671_v46 }
 0xb15   : > { %v1565_v47 = vpop.xlane.xlu0 %1564 }
 0xb16   : > { %3274 = vrcp.f32 %v1565_v47 }
 0xb1d   : > { %v1673_v48 = vpop.xlane.xlu1 %1672 }
 0xb1e   : > { %3276 = vrcp.f32 %v1673_v48 }
 0xb20   : > { %v3275_v49 = vpop.eup %3274 }
 0xb21   : > { %v1567_v51 = vmul.f32 %v3275_v49, %v3271_v42 }
 0xb23   : > { %v1568_v52 = vpack.c.bf16 %v1567_v51, %v1567_v51 }
 0xb25   : > { %3045 = vmatmul.mubr.msk.bf16.vlgmr.msra.gmra.mrb[40].mxu0 %vm666_vm5, %v1568_v52 }
 0xb26   : > { %3055 = vmatpush3.bf16.msra.mxu0 %v1683_v53  ;;  %3056 = vmatprep.mubr.msk.bf16.mxu0 %vm3402_vm2, %v3401_v18 }
 0xb27   : > { %3066 = vmatprep.subr.bf16.mxu0 %v3401_v18 }
 0xb28   : > { %v3277_v54 = vpop.eup %3276 }
 0xb29   : > { %v1675_v55 = vmul.f32 %v3277_v54, %v3273_v45 }
 0xb2b   : > { %v1676_v57 = vpack.c.bf16 %v1675_v55, %v1675_v55 }
 0xb2d   : > { %3057 = vmatmul.mubr.msk.bf16.vlgmr.msra.gmra.mrb[44].mxu0 %vm666_vm5, %v1676_v57 }
 0xb2e   : > { %3067 = vmatpush3.bf16.msra.mxu0 %v3236_v56  ;;  %3070 = vmatprep.mubr.msk.bf16.mxu0 %vm3402_vm2, %v3401_v18 }
 0xb2f   : > { %3068 = vmatprep.subr.bf16.mxu0 %v3401_v18 }
 0xb32   : > { %3069 = vmatpush3.bf16.msra.mxu0 %v3237_v58 }
 0xb33   : > { %3082 = vmatprep.subr.bf16.mxu0 %v3401_v18 }
 0xb35   : > { %3071 = vmatmul.mubr.msk.bf16.vlgmr.msra.gmra.mrb[48].mxu0 %vm399_vm1, %v3581_v43 }
 0xb36   : > { %3083 = vmatpush3.bf16.msra.mxu0 %v3238_v59  ;;  %3086 = vmatprep.mubr.msk.bf16.mxu0 %vm3402_vm2, %v3401_v18 }
 0xb37   : > { %3084 = vmatprep.subr.bf16.mxu0 %v3401_v18 }
 0xb3a   : > { %3085 = vmatpush3.bf16.msra.mxu0 %v3239_v60 }
 0xb3b   : > { %3096 = vmatprep.subr.bf16.mxu0 %v3401_v18 }
 0xb3d   : > { %3087 = vmatmul.mubr.msk.bf16.vlgmr.msra.gmra.mrb[52].mxu0 %vm399_vm1, %v3581_v43 }
 0xb3e   : > { %3098 = vmatprep.mubr.msk.bf16.mxu0 %vm3402_vm2, %v3401_v18 }
 0xbf8   : > { %v1609_v62 = vpop.f32.mrb[40].mxu0 }
 0xbf9   : > { %v3046_v63 = vpop.f32.mrb[41].mxu0 }
 0xbfa   : > { %v1612_v0 = vpop.f32.mrb[42].mxu0 }
 0xbfb   : > { %v3047_v1 = vpop.f32.mrb[43].mxu0 }
 0xc00   : > { %v1719_v2 = vpop.f32.mrb[44].mxu0 }
 0xc01   : > { %v1725_v5 = vpack.c.bf16 %v1719_v2, %v1609_v62  ;;  %v3058_v6 = vpop.f32.mrb[45].mxu0 }
 0xc02   : > { %v1722_v8 = vpop.f32.mrb[46].mxu0 }
 0xc03   : > { %v3059_v9 = vpop.f32.mrb[47].mxu0  ;;  %3063 = vmatmul.mubr.msk.bf16.vlgmr.msra.gmra.mrb[44].mxu1 %vm619_vm3, %v1725_v5  ;;  %v3243_v5 = vld [vmem:[%s3538_s8 + $0x18] sm:$0xff]  }
 0xc04   : > { %3075 = vmatpush3.bf16.msra.mxu1 %v3241_v3  ;;  %3078 = vmatprep.mubr.msk.bf16.mxu1 %vm3402_vm2, %v3401_v18 }
 0xc05   : > { %3076 = vmatprep.subr.bf16.mxu1 %v3401_v18 }
 0xc08   : > { %v1832_v11 = vpop.f32.mrb[48].mxu0  ;;  %3077 = vmatpush3.bf16.msra.mxu1 %v3242_v10 }
 0xc09   : > { %v3072_v12 = vpop.f32.mrb[49].mxu0  ;;  %3090 = vmatprep.subr.bf16.mxu1 %v3401_v18 }
 0xc0a   : > { %v1835_v13 = vpop.f32.mrb[50].mxu0 }
 0xc0b   : > { %v1839_v14 = vpack.c.bf16 %v1835_v13, %v1832_v11  ;;  %v3073_v15 = vpop.f32.mrb[51].mxu0  ;;  %3079 = vmatmul.mubr.msk.bf16.vlgmr.msra.gmra.mrb[48].mxu1 %vm399_vm1, %v3581_v43 }
 0xc0c   : > { %3092 = vmatprep.mubr.msk.bf16.mxu1 %vm3402_vm2, %v3401_v18 }
 0xc10   : > { %v1950_v16 = vpop.f32.mrb[52].mxu0 }
 0xc11   : > { %v3088_v17 = vpop.f32.mrb[53].mxu0 }
 0xc12   : > { %v1953_v19 = vpop.f32.mrb[54].mxu0 }
 0xc13   : > { %v3782_v20 = vpack.c.bf16 %v1953_v19, %v1950_v16  ;;  %v3089_v21 = vpop.f32.mrb[55].mxu0  ;;  %v2232_v16 = vsub.s32 2, %v3571_v28 }
 0xc15   : > { %v2020_v22 = vsel %vm682_vm4, %v3782_v20, 0  ;;  %v2125_v61 = vrot.slane %v3782_v20, 4  ;;  %v2233_v20 = vrot.slane %v3575_v30, %v2232_v16 }
 0xc16   : > { %3097 = vmatpush3.bf16.msra.mxu0 %v2020_v22 }
 0xc17   : > { %3108 = vmatprep.subr.bf16.mxu0 %v3401_v18  ;;  %v2130_v0 = vsel %vm682_vm4, %v2125_v61, 0 }
 0xcd6   : > { %v1772_v23 = vpop.f32.mrb[44].mxu1 }
 0xcd7   : > { %v3788_v25 = vadd.f32 %v1772_v23, %v3727_v4  ;;  %v3064_v43 = vpop.f32.mrb[45].mxu1  ;;  %v3298_v23 = vld [vmem:[#allocation2] sm:$0xff] }
 0xcd8   : > { %v1775_v26 = vpop.f32.mrb[46].mxu1 }
 0xcd9   : > { %v3791_v27 = vadd.f32 %v1775_v26, %v3729_v7  ;;  %v3065_v29 = vpop.f32.mrb[47].mxu1  ;;  %v2063_v7 = vrot.slane %v1839_v14, 4 }
 0xcde   : > { %v1891_v31 = vpop.f32.mrb[48].mxu1 }
 0xcdf   : > { %v3080_v32 = vpop.f32.mrb[49].mxu1 }
 0xce0   : > { %v1894_v33 = vpop.f32.mrb[50].mxu1  ;;  %v3299_v32 = vld [vmem:[#allocation2 + $0x8] sm:$0xff] }
 0xce1   : > { %v1898_v34 = vpack.c.bf16 %v1894_v33, %v1891_v31  ;;  %v3081_v35 = vpop.f32.mrb[51].mxu1 }
 0xce3   : > { %v1962_v36 = vsel %vm619_vm3, %v1898_v34, 0  ;;  %v2065_v37 = vrot.slane %v1898_v34, 4 }
 0xce4   : > { %3091 = vmatpush3.bf16.xpose.msra.mxu1 %v1962_v36 }
 0xce5   : > { %3102 = vmatprep.subr.bf16.mxu1 %v3401_v18  ;;  %v2070_v4 = vsel %vm619_vm3, %v2065_v37, 0 }
 0xceb   : > { %3093 = vmatmul.mubr.msk.bf16.vlgmr.msra.gmra.mrb[52].mxu1 %vm619_vm3, %v1839_v14 }
 0xcec   : > { %3103 = vmatpush3.bf16.xpose.msra.mxu1 %v2070_v4  ;;  %3104 = vmatprep.mubr.msk.bf16.mxu1 %vm3402_vm2, %v3401_v18 }
 0xced   : > { %3114 = vmatprep.subr.bf16.mxu1 %v3401_v18 }
 0xcf3   : > { %3105 = vmatmul.mubr.msk.bf16.vlgmr.msra.gmra.mrb[56].mxu1 %vm619_vm3, %v2063_v7 }
 0xcf4   : > { %3116 = vmatprep.mubr.msk.bf16.mxu1 %vm3402_vm2, %v3401_v18  ;;  %3115 = vmatpush3.bf16.msra.mxu1 %v3243_v5  ;;  %v2281_v5 = vsub.s32 6, %v3571_v28 }
 0xcf5   : > { %3128 = vmatprep.subr.bf16.mxu1 %v3401_v18 }
 0xdbe   : > { %v1998_v38 = vpop.f32.mrb[52].mxu1 }
 0xdbf   : > { %v3094_v39 = vpop.f32.mrb[53].mxu1  ;;  %v2004_v40 = vsel %vm666_vm5, %v1998_v38, -inf }
 0xdc0   : > { %2005 = vmax.xlane.f32.xlu0 %v2004_v40  ;;  %v2001_v24 = vpop.f32.mrb[54].mxu1 }
 0xdc1   : > { %v3095_v41 = vpop.f32.mrb[55].mxu1 }
 0xdc6   : > { %v2106_v42 = vpop.f32.mrb[56].mxu1 }
 0xdc7   : > { %v3106_v44 = vpop.f32.mrb[57].mxu1  ;;  %v2112_v45 = vsel %vm666_vm5, %v2106_v42, -inf }
 0xdc8   : > { %2113 = vmax.xlane.f32.xlu1 %v2112_v45  ;;  %v2109_v46 = vpop.f32.mrb[58].mxu1  ;;  %v3245_v44 = vld [vmem:[%s3543_s9 + $0x8] sm:$0xff]  }
 0xdc9   : > { %v3107_v47 = vpop.f32.mrb[59].mxu1 }
 0xe4d   : > { %v2006_v48 = vpop.xlane.xlu0 %2005 }
 0xe4e   : > { %v2007_v49 = vsub.f32 %v1998_v38, %v2006_v48 }
 0xe50   : > { %v2008_v50 = vmul.f32 1.442695, %v2007_v49 }
 0xe52   : > { %3278 = vpow2.f32 %v2008_v50 }
 0xe55   : > { %v2114_v51 = vpop.xlane.xlu1 %2113 }
 0xe56   : > { %v2115_v52 = vsub.f32 %v2106_v42, %v2114_v51  ;;  %v3244_v42 = vld [vmem:[%s3543_s9] sm:$0xff]   ;;  %v2264_v51 = vsub.s32 3, %v3571_v28 }
 0xe58   : > { %v2116_v53 = vmul.f32 1.442695, %v2115_v52  ;;  %v2265_v52 = vrot.slane %v3575_v30, %v2264_v51  ;;  %v3246_v30 = vld [vmem:[%s3548_s16] sm:$0xff]  }
 0xe5a   : > { %3280 = vpow2.f32 %v2116_v53  ;;  %v2270_v53 = vsub.s32 4, %v3571_v28 }
 0xe5c   : > { %v3279_v54 = vpop.eup %3278 }
 0xe5d   : > { %v2010_v55 = vsel %vm666_vm5, %v3279_v54, 0.0 }
 0xe5e   : > { %2011 = vadd.xlane.f32.xlu0 %v2010_v55 }
 0xe64   : > { %v3281_v56 = vpop.eup %3280 }
 0xe65   : > { %v2118_v57 = vsel %vm666_vm5, %v3281_v56, 0.0 }
 0xe66   : > { %2119 = vadd.xlane.f32.xlu1 %v2118_v57 }
 0xeeb   : > { %v2012_v58 = vpop.xlane.xlu0 %2011 }
 0xeec   : > { %3282 = vrcp.f32 %v2012_v58 }
 0xef3   : > { %v2120_v59 = vpop.xlane.xlu1 %2119 }
 0xef4   : > { %3284 = vrcp.f32 %v2120_v59  ;;  %v3844_v59 = vld [vmem:[%s3528_s11] sm:$0xff] }
 0xef6   : > { %v3283_v60 = vpop.eup %3282 }
 0xef7   : > { %v2014_v62 = vmul.f32 %v3283_v60, %v3279_v54  ;;  %v2271_v60 = vrot.slane %v3844_v59, %v2270_v53 }
 0xef9   : > { %v2015_v63 = vpack.c.bf16 %v2014_v62, %v2014_v62 }
 0xefb   : > { %3099 = vmatmul.mubr.msk.bf16.vlgmr.msra.gmra.mrb[56].mxu0 %vm666_vm5, %v2015_v63 }
 0xefc   : > { %3109 = vmatpush3.bf16.msra.mxu0 %v2130_v0  ;;  %3110 = vmatprep.mubr.msk.bf16.mxu0 %vm3402_vm2, %v3401_v18 }
 0xefd   : > { %3120 = vmatprep.subr.bf16.mxu0 %v3401_v18 }
 0xefe   : > { %v3285_v1 = vpop.eup %3284 }
 0xeff   : > { %v2122_v2 = vmul.f32 %v3285_v1, %v3281_v56  ;;  %v3247_v1 = vld [vmem:[%s3548_s16 + $0x8] sm:$0xff]  }
 0xf01   : > { %v2123_v3 = vpack.c.bf16 %v2122_v2, %v2122_v2  ;;  %v3248_v2 = vld [vmem:[%s3548_s16 + $0x10] sm:$0xff]  }
 0xf03   : > { %3111 = vmatmul.mubr.msk.bf16.vlgmr.msra.gmra.mrb[60].mxu0 %vm666_vm5, %v2123_v3  ;;  %v3249_v3 = vld [vmem:[%s3548_s16 + $0x18] sm:$0xff]  }
 0xf04   : > { %3124 = vmatprep.mubr.msk.bf16.mxu0 %vm3402_vm2, %v3401_v18  ;;  %3121 = vmatpush3.bf16.msra.mxu0 %v3244_v42 }
 0xf05   : > { %3122 = vmatprep.subr.bf16.mxu0 %v3401_v18 }
 0xf08   : > { %3123 = vmatpush3.bf16.msra.mxu0 %v3245_v44 }
 0xfce   : > { %v2056_v6 = vpop.f32.mrb[56].mxu0 }
 0xfcf   : > { %v3100_v8 = vpop.f32.mrb[57].mxu0 }
 0xfd0   : > { %v2059_v9 = vpop.f32.mrb[58].mxu0 }
 0xfd1   : > { %v3101_v10 = vpop.f32.mrb[59].mxu0 }
 0xfd6   : > { %v2166_v11 = vpop.f32.mrb[60].mxu0 }
 0xfd7   : > { %v2172_v12 = vpack.c.bf16 %v2166_v11, %v2056_v6  ;;  %v3112_v13 = vpop.f32.mrb[61].mxu0  ;;  %v2282_v6 = vrot.slane %v3844_v59, %v2281_v5 }
 0xfd8   : > { %v2169_v14 = vpop.f32.mrb[62].mxu0 }
 0xfd9   : > { %v3113_v15 = vpop.f32.mrb[63].mxu0  ;;  %3117 = vmatmul.mubr.msk.bf16.vlgmr.msra.gmra.mrb[60].mxu1 %vm619_vm3, %v2172_v12 }
 0xfda   : > { %3136 = vmatprep.mubr.msk.bf16.mxu1 %vm3402_vm2, %v3401_v18  ;;  %3129 = vmatpush3.bf16.msra.mxu1 %v3246_v30 }
 0xfdb   : > { %3130 = vmatprep.subr.bf16.mxu1 %v3401_v18 }
 0xfde   : > { %3131 = vmatpush3.bf16.msra.mxu1 %v3247_v1 }
 0xfdf   : > { %3132 = vmatprep.subr.bf16.mxu1 %v3401_v18 }
 0xfe2   : > { %3133 = vmatpush3.bf16.msra.mxu1 %v3248_v2 }
 0xfe3   : > { %3134 = vmatprep.subr.bf16.mxu1 %v3401_v18 }
 0xfe6   : > { %3135 = vmatpush3.bf16.msra.mxu1 %v3249_v3  ;;  %v2404_v3 = vsub.s32 5, %v3571_v28 }
 0xfe8   : > { %v2405_v5 = vrot.slane %v3844_v59, %v2404_v3 }
0x10ac   : > { %v2219_v17 = vpop.f32.mrb[60].mxu1 }
0x10ad   : > { %v2226_v19 = vadd.f32 %v2219_v17, %v3788_v25  ;;  %v3118_v21 = vpop.f32.mrb[61].mxu1 }
0x10ae   : > { %v2222_v22 = vpop.f32.mrb[62].mxu1 }
0x10af   : > { %v2228_v43 = vadd.f32 %v3298_v23, %v2226_v19  ;;  %v2227_v26 = vadd.f32 %v2222_v22, %v3791_v27  ;;  %v3119_v29 = vpop.f32.mrb[63].mxu1 }
0x10b1   : > { %v3825_v31 = vadd.f32 %v2233_v20, %v2228_v43  ;;  %v2229_v33 = vadd.f32 %v3299_v32, %v2227_v26 }
0x10b3   : > { %v3827_v34 = vadd.f32 %v2233_v20, %v2229_v33  ;;  %v2236_v35 = vsel %vm399_vm1, %v3825_v31, 0.0 }
0x10b4   : > { %2237 = vadd.xlane.f32.xlu0 %v2236_v35 }
0x10b5   : > { %v2239_v25 = vsel %vm399_vm1, %v3827_v34, 0.0 }
0x10b6   : > { %2240 = vadd.xlane.f32.xlu1 %v2239_v25 }
0x1141   : > { %v2238_v36 = vpop.xlane.xlu0 %2237 }
0x1142   : > { %v2242_v37 = vmul.f32 0.03125, %v2238_v36 }
0x1143   : > { %v2241_v27 = vpop.xlane.xlu1 %2240 }
0x1144   : > { %v2244_v4 = vsub.f32 %v3825_v31, %v2242_v37  ;;  %v2243_v7 = vmul.f32 0.03125, %v2241_v27 }
0x1146   : > { %v2245_v38 = vsub.f32 %v3827_v34, %v2243_v7  ;;  %v2246_v39 = vmul.f32 %v2244_v4, %v2244_v4 }
0x1148   : > { %v2248_v40 = vsel %vm399_vm1, %v2246_v39, 0.0  ;;  %v2247_v24 = vmul.f32 %v2245_v38, %v2245_v38 }
0x1149   : > { %2249 = vadd.xlane.f32.xlu0 %v2248_v40 }
0x114a   : > { %v2251_v41 = vsel %vm399_vm1, %v2247_v24, 0.0 }
0x114b   : > { %2252 = vadd.xlane.f32.xlu1 %v2251_v41 }
0x11d6   : > { %v2250_v45 = vpop.xlane.xlu0 %2249 }
0x11d7   : > { %v2254_v46 = vmul.f32 0.03125, %v2250_v45 }
0x11d8   : > { %v2253_v47 = vpop.xlane.xlu1 %2252 }
0x11d9   : > { %v2256_v48 = vadd.f32 1e-05, %v2254_v46  ;;  %v2255_v49 = vmul.f32 0.03125, %v2253_v47 }
0x11db   : > { %3286 = vrsqrt.f32 %v2256_v48  ;;  %v2257_v50 = vadd.f32 1e-05, %v2255_v49 }
0x11dd   : > { %3288 = vrsqrt.f32 %v2257_v50 }
0x11e5   : > { %v3287_v54 = vpop.eup %3286 }
0x11e6   : > { %v2260_v55 = vmul.f32 %v3287_v54, %v2244_v4 }
0x11e7   : > { %v3289_v56 = vpop.eup %3288 }
0x11e8   : > { %v2266_v57 = vmul.f32 %v2265_v52, %v2260_v55  ;;  %v2261_v58 = vmul.f32 %v3289_v56, %v2245_v38 }
0x11ea   : > { %v2267_v61 = vmul.f32 %v2265_v52, %v2261_v58  ;;  %v2272_v62 = vadd.f32 %v2271_v60, %v2266_v57 }
0x11ec   : > { %v2273_v63 = vadd.f32 %v2271_v60, %v2267_v61 }
0x11ee   : > { %v2274_v0 = vpack.c.bf16 %v2273_v63, %v2272_v62 }
0x11f0   : > { %3125 = vmatmul.mubr.msk.bf16.vlgmr.msra.gmra.mrb[64].mxu0 %vm399_vm1, %v2274_v0 }
0x12c3   : > { %v2332_v8 = vpop.f32.mrb[64].mxu0 }
0x12c4   : > { %v2333_v9 = vadd.f32 %v2332_v8, %v2282_v6  ;;  %v3126_v10 = vpop.f32.mrb[65].mxu0 }
0x12c5   : > { %v2335_v11 = vpop.f32.mrb[66].mxu0 }
0x12c6   : > { %v2341_v12 = vmul.f32 0.70710677, %v2333_v9  ;;  %v2336_v13 = vadd.f32 %v2335_v11, %v2282_v6  ;;  %v3127_v14 = vpop.f32.mrb[67].mxu0  ;;  %v2339_v62 = vmul.f32 0.5, %v2333_v9 }
0x12c8   : > { %v2343_v15 = vand.u32 2147483647, %v2341_v12  ;;  %v2342_v16 = vmul.f32 0.70710677, %v2336_v13  ;;  %vm2383_vm6 = vcmp.ge.f32.partialorder %v2341_v12, 0.0  ;;  %v2340_v63 = vmul.f32 0.5, %v2336_v13 }
0x12ca   : > { %v2345_v17 = vmul.f32 0.3275911, %v2343_v15  ;;  %v2344_v19 = vand.u32 2147483647, %v2342_v16  ;;  %v2371_v22 = vsub.f32 0.0, %v2343_v15  ;;  %vm2384_vm7 = vcmp.ge.f32.partialorder %v2342_v16, 0.0 }
0x12cc   : > { %v2347_v20 = vadd.f32 1.0, %v2345_v17  ;;  %v2346_v21 = vmul.f32 0.3275911, %v2344_v19  ;;  %v2372_v23 = vsub.f32 0.0, %v2344_v19  ;;  %v2373_v26 = vmul.f32 %v2371_v22, %v2343_v15 }
0x12ce   : > { %3290 = vrcp.f32 %v2347_v20  ;;  %v2348_v18 = vadd.f32 1.0, %v2346_v21  ;;  %v2374_v35 = vmul.f32 %v2372_v23, %v2344_v19  ;;  %v2375_v25 = vmul.f32 1.442695, %v2373_v26 }
0x12d0   : > { %3292 = vrcp.f32 %v2348_v18  ;;  %v2377_v7 = vmul.f32 1.442695, %v2374_v35 }
0x12d1   : > { %3294 = vpow2.f32 %v2375_v25  ;;  %v2808_v25 = vld [vmem:[%s3947_s6] ss:$0 sm:$0xff] (!%p2807_p1) }
0x12d2   : > { %3296 = vpow2.f32 %v2377_v7 }
0x12d8   : > { %v3291_v43 = vpop.eup %3290 }
0x12d9   : > { %v2353_v29 = vmul.f32 1.0614054, %v3291_v43 }
0x12da   : > { %v3293_v32 = vpop.eup %3292 }
0x12db   : > { %v2355_v33 = vadd.f32 -1.4531521, %v2353_v29  ;;  %v2354_v36 = vmul.f32 1.0614054, %v3293_v32  ;;  %v3295_v48 = vpop.eup %3294 }
0x12dc   : > { %v3297_v52 = vpop.eup %3296 }
0x12dd   : > { %v2357_v37 = vmul.f32 %v3291_v43, %v2355_v33  ;;  %v2356_v27 = vadd.f32 -1.4531521, %v2354_v36 }
0x12df   : > { %v2359_v4 = vadd.f32 1.4214138, %v2357_v37  ;;  %v2358_v38 = vmul.f32 %v3293_v32, %v2356_v27  ;;  %v2809_v37 = vld [vmem:[%s3947_s6 + $0x1] ss:$0 sm:$0xff] (!%p2807_p1) }
0x12e1   : > { %v2361_v39 = vmul.f32 %v3291_v43, %v2359_v4  ;;  %v2360_v40 = vadd.f32 1.4214138, %v2358_v38 }
0x12e3   : > { %v2363_v24 = vadd.f32 -0.28449672, %v2361_v39  ;;  %v2362_v41 = vmul.f32 %v3293_v32, %v2360_v40 }
0x12e5   : > { %v2365_v42 = vmul.f32 %v3291_v43, %v2363_v24  ;;  %v2364_v44 = vadd.f32 -0.28449672, %v2362_v41 }
0x12e7   : > { %v2367_v45 = vadd.f32 0.2548296, %v2365_v42  ;;  %v2366_v46 = vmul.f32 %v3293_v32, %v2364_v44 }
0x12e9   : > { %v2369_v47 = vmul.f32 %v3291_v43, %v2367_v45  ;;  %v2368_v49 = vadd.f32 0.2548296, %v2366_v46 }
0x12eb   : > { %v2379_v50 = vmul.f32 %v3295_v48, %v2369_v47  ;;  %v2370_v51 = vmul.f32 %v3293_v32, %v2368_v49 }
0x12ed   : > { %v2381_v53 = vsub.f32 1.0, %v2379_v50  ;;  %v2380_v54 = vmul.f32 %v3297_v52, %v2370_v51 }
0x12ef   : > { %v2385_v55 = vsub.f32 0.0, %v2381_v53  ;;  %v2382_v56 = vsub.f32 1.0, %v2380_v54 }
0x12f1   : > { %v2387_v57 = vsel %vm2383_vm6, %v2381_v53, %v2385_v55  ;;  %v2386_v58 = vsub.f32 0.0, %v2382_v56 }
0x12f2   : > { %v2389_v60 = vadd.f32 1.0, %v2387_v57 }
0x12f3   : > { %v2388_v61 = vsel %vm2384_vm7, %v2382_v56, %v2386_v58 }
0x12f4   : > { %v2390_v0 = vadd.f32 1.0, %v2388_v61  ;;  %v2391_v30 = vmul.f32 %v2389_v60, %v2339_v62 }
0x12f6   : > { %v2392_v1 = vmul.f32 %v2390_v0, %v2340_v63 }
0x12f8   : > { %v2393_v2 = vpack.c.bf16 %v2392_v1, %v2391_v30 }
0x12fa   : > { %3137 = vmatmul.mubr.msk.bf16.vlgmr.msra.gmra.mrb[64].mxu1 %vm2430_vm8, %v2393_v2 }
0x13cd   : > { %v2468_v6 = vpop.f32.mrb[64].mxu1 }
0x13ce   : > { %v2469_v8 = vadd.f32 %v2468_v6, %v2405_v5  ;;  %v3138_v10 = vpop.f32.mrb[65].mxu1  ;;  %2482 = sbr.rel (%p2807_p1) target bundleno = 5392 (0x1510), region = 56 }
0x13cf   : > { %v2471_v11 = vpop.f32.mrb[66].mxu1 }
0x13d0   : > { %v2475_v12 = vadd.f32 %v2469_v8, %v3825_v31  ;;  %v2472_v14 = vadd.f32 %v2471_v11, %v2405_v5  ;;  %v3139_v15 = vpop.f32.mrb[67].mxu1 }
0x13d2   : > { %2477 = vst.msk [vmem:[#allocation2] sm:$0xff] %vm399_vm1, %v2475_v12  ;;  %v2476_v9 = vadd.f32 %v2472_v14, %v3827_v34  ;;  %v2485_v28 = vsel (!%p2807_p1), %vm399_vm1, %v2475_v12, 0.0 }
0x13d3   : > { %2486 = vadd.xlane.f32.xlu0 (!%p2807_p1), %v2485_v28 }
0x13d4   : > { %2478 = vst.msk [vmem:[#allocation2 + $0x8] sm:$0xff] %vm399_vm1, %v2476_v9  ;;  %v2488_v59 = vsel (!%p2807_p1), %vm399_vm1, %v2476_v9, 0.0 }
0x13d7   : > { %2489 = vadd.xlane.f32.xlu0 %v2488_v59 }
0x1460   : > { %v2487_v13 = vpop.xlane.xlu0 %2486 }
0x1461   : > { %v2491_v16 = vmul.f32 0.03125, %v2487_v13 }
0x1463   : > { %v2493_v31 = vsub.f32 %v2475_v12, %v2491_v16 }
0x1464   : > { %v2490_v17 = vpop.xlane.xlu0 %2489 }
0x1465   : > { %v2492_v19 = vmul.f32 0.03125, %v2490_v17  ;;  %v2495_v20 = vmul.f32 %v2493_v31, %v2493_v31 }
0x1467   : > { %v2494_v21 = vsub.f32 %v2476_v9, %v2492_v19  ;;  %v2497_v34 = vsel %vm399_vm1, %v2495_v20, 0.0 }
0x1468   : > { %2498 = vadd.xlane.f32.xlu1 %v2497_v34 }
0x1469   : > { %v2496_v18 = vmul.f32 %v2494_v21, %v2494_v21 }
0x146b   : > { %v2500_v22 = vsel %vm399_vm1, %v2496_v18, 0.0 }
0x146c   : > { %2501 = vadd.xlane.f32.xlu1 %v2500_v22 }
0x14f5   : > { %v2499_v23 = vpop.xlane.xlu1 %2498 }
0x14f6   : > { %v2503_v43 = vmul.f32 0.03125, %v2499_v23 }
0x14f8   : > { %v2505_v26 = vadd.f32 1e-05, %v2503_v43 }
0x14f9   : > { %v2502_v29 = vpop.xlane.xlu1 %2501 }
0x14fa   : > { %3301 = vrsqrt.f32 %v2505_v26  ;;  %v2504_v32 = vmul.f32 0.03125, %v2502_v29 }
0x14fc   : > { %v2506_v33 = vadd.f32 1e-05, %v2504_v32 }
0x14fe   : > { %3303 = vrsqrt.f32 %v2506_v33 }
0x1504   : > { %v3302_v35 = vpop.eup %3301 }
0x1505   : > { %v2509_v36 = vmul.f32 %v3302_v35, %v2493_v31 }
0x1507   : > { %v2515_v27 = vmul.f32 %v2808_v25, %v2509_v36 }
0x1508   : > { %v3304_v4 = vpop.eup %3303 }
0x1509   : > { %v2521_v7 = vadd.f32 %v2809_v37, %v2515_v27  ;;  %v2510_v38 = vmul.f32 %v3304_v4, %v2494_v21 }
0x150b   : > { %2523 = vst.msk [vmem:[%s3550_s21] sm:$0xff] %vm399_vm1, %v2521_v7  ;;  %v2516_v39 = vmul.f32 %v2808_v25, %v2510_v38 }
0x150d   : > { %v2522_v40 = vadd.f32 %v2809_v37, %v2516_v39 }
0x150f   : > { %2524 = vst.msk [vmem:[%s3550_s21 + $0x8] sm:$0xff] %vm399_vm1, %v2522_v40 }
0x1510 PF: > { %s2819_s30 = sshll.u32 %s3387_s28, 8  ;;  %s2539_s17 = sshll.u32 %s3550_s21, 4  ;;  %s3885_s17 = int_to_ptr.vmem [resolvable:$true] %s2539_s17 }
0x1511   : > { %s3882_s14 = scalar_lea.hbm %s3948_s7, %s2819_s30  ;;  %s3969_s18 = sand.u32 1, %s3375_s25  }
0x1512   : > { %s3889_s19 = scalar_lea.sflag [#allocation4], %s3969_s18  ;;  %s3305_s10 = scalar_lea.vmem %s3885_s17, 256 }
0x1513   : > { %p3306_p2 = scmp.ne.s32.totalorder %s3885_s17, %s3305_s10  ;;  %s3403_s28 = smov [#allocation3]  }
0x1514   : > { %s3309_s20 = sshll.u32 %s3403_s28, 4  ;;  %s3310_s20 = int_to_ptr.vmem [resolvable:$false] %s3309_s20 }
0x1515   : > { %p3307_p4 = pnand %p3306_p2, %p3495_p3  ;;  %s3311_s22 = scalar_lea.vmem %s3310_s20, 512 }
0x1516   : > { %p3312_p6 = scmp.lt.s32.totalorder %s3885_s17, %s3310_s20  ;;  %p3313_p7 = scmp.lt.s32.totalorder %s3311_s22, %s3305_s10 }
0x1517   : > { %p3308_p5 = pneg %p3307_p4 }
0x1518   : > { %p3314_p8 = por %p3313_p7, %p3312_p6 }
0x151a   : > { %p3315_p10 = pnand %p3314_p8, %p3308_p5 }
0x151c   : > { %3318 = shalt.err (!%p3315_p10)
}
0x151d   : > { %s3319_s23 = scalar_lea.hbm %s3882_s14, 256  ;;  %s3323_s15 = scalar_lea.hbm %s3948_s7, 512 }
0x151e   : > { %p3320_p11 = scmp.ne.s32.totalorder %s3882_s14, %s3319_s23  ;;  %p3324_p0 = scmp.lt.u32.totalorder %s3882_s14, %s3948_s7 }
0x151f   : > { %p3325_p1 = scmp.lt.u32.totalorder %s3323_s15, %s3319_s23  ;;  %p3327_p4 = scmp.lt.u32.totalorder %s3319_s23, %s3882_s14 }
0x1520   : > { %p3321_p12 = pnand %p3320_p11, %p3495_p3 }
0x1521   : > { %p3326_p2 = por %p3325_p1, %p3324_p0 }
0x1522   : > { %p3322_p13 = pneg %p3321_p12 }
0x1523   : > { %p3328_p5 = por %p3327_p4, %p3326_p2 }
0x1525   : > { %p3329_p6 = pnand %p3328_p5, %p3322_p13 }
0x1527   : > { %3332 = shalt.err (!%p3329_p6)
}
0x1528   : > { %s3404_s24 = smov 128   ;;  %s3405_s26 = smov 8  }
0x1529   : > { %3141 = dma.vmem_to_hbm [thread:$0]  (%p3495_p3), %s3885_s17, 256, %s3882_s14, %s3889_s19, %s3404_s24, %s3404_s24, %s3405_s26  }
0x152a PF: > { %s3970_s27 = sld [smem:[#allocation10_spill]]  ;;  %s3971_s29 = sld [smem:[#allocation6_spill]] }
0x1530   : > { %p3147_p7 = scmp.ge.s32.totalorder %s3970_s27, 2  ;;  %s2554_s8 = sand.u32 1, %s3971_s29  }
0x1531   : > { %s2555_s11 = scalar_lea.sflag [#allocation4], %s2554_s8 }
0x1532   : > { %p3144_p8 = pnand %p3147_p7, %p3505_p9 }
0x1534   : > { %3366 = dma.done.wait (!%p3144_p8), %s2555_s11, 256  }
0x1535   : > { %3368 = vsyncadd (!%p3144_p8), %s2555_s11, 4294967040  ;;  %s20_s8 = sadd.s32 1, %s3970_s27   ;;  %s3973_s18 = sld [smem:[#allocation7_spill]] }
0x1536   : > { %p17_p10 = scmp.ge.s32.totalorder %s20_s8, 6   ;;  %s3974_s26 = sld [smem:[#allocation14_spill]] }
0x1537   : > { %s3975_s27 = sld [smem:[#allocation8_spill]]  ;;  %s3976_s28 = sld [smem:[#allocation9_spill]] }
0x1538   : > { %s3977_s29 = sld [smem:[#allocation11_spill]]  ;;  %s3978_s30 = sld [smem:[#allocation12_spill]] }
0x1539   : > { %s3979_s24 = smov %s3375_s25  ;;  %19 = sbr.rel (!%p17_p10) target bundleno = 5 (0x5), region = 120 }
0x153b   : > { %s3980_s25 = smov %s3973_s18 }
0x1540   :  { %2560 = vsyncpa [#allocation4], 1 }
0x1541   :  { %2562 = vsyncpa [#allocation4 + $0x1], 1 }

</bundles_post_ra>
